<compile_context>
chip_gen: v6e
topology: v6e:2x2x1
jax: 0.10.0
libtpu: 0.0.40
codegen_flags: <defaults>
</compile_context>

<pallas_src>
import math
import functools

import jax
import jax.numpy as jnp
from jax.experimental import pallas as pl
from jax.experimental.pallas import tpu as pltpu


N_PAD = 128       # lane-dense padded width of the decoder output slab
MASK_NEG = -1e30  # additive mask value (exp underflows to exact 0)


# ----------------------------- fused Pallas kernel --------------------------

def _fused_transformer_kernel(
    ids_ref, mask_ref, emb_ref, pe_ref,
    w_in_ref, b_in_ref, w_out_ref, b_out_ref,
    w1_ref, b1_ref, w2_ref, b2_ref,
    ln1_g_ref, ln1_b_ref, ln2_g_ref, ln2_b_ref,
    dec_w_ref, dec_b_ref,
    o_ref,
    *, B, S, F, H, Dh, ntoken, nlayers,
):
    D = H * Dh
    BS = B * S
    f32 = jnp.float32

    def bf16(a):
        return a.astype(jnp.bfloat16)      # MXU operands bf16, accumulate f32

    def layernorm(v, g, b):                # f32 elementwise (v5e-safe)
        mu = jnp.mean(v, axis=-1, keepdims=True)
        var = jnp.mean((v - mu) * (v - mu), axis=-1, keepdims=True)
        return (v - mu) * jax.lax.rsqrt(var + 1e-5) * g + b

    # ---- fused embedding gather: one-hot matmul vs kron(I_F, emb) table ----
    # (sqrt(ninp) is folded into emb_ref; output columns already in (f, d)
    #  order, matching the PyTorch reshape to (B, S, F*ninp))
    ids = ids_ref[...]                                           # (BS, F) int32
    tok_iota = jax.lax.broadcasted_iota(jnp.int32, (BS, ntoken), 1)
    onehot = jnp.concatenate(
        [(ids[:, f:f + 1] == tok_iota).astype(f32) for f in range(F)], axis=1)
    x = jnp.dot(onehot, emb_ref[...], preferred_element_type=f32)  # (BS, D)
    x = x + jnp.tile(pe_ref[:S, :], (B, 1))                        # + pos enc

    big_mask = mask_ref[...]        # (H*BS, H*BS) block-diagonal additive mask

    for l in range(nlayers):        # static unroll (nlayers is small)
        # ---- fused QKV projection (1/sqrt(Dh) pre-folded into Q weights) ----
        qkv = jnp.dot(bf16(x), w_in_ref[l],
                      preferred_element_type=f32) + b_in_ref[l]    # (BS, 3D)

        # ---- pack heads along rows: (H*BS, Dh), block order (h, b) ----
        q_p = jnp.concatenate(
            [qkv[:, h * Dh:(h + 1) * Dh] for h in range(H)], axis=0)
        k_p = jnp.concatenate(
            [qkv[:, D + h * Dh:D + (h + 1) * Dh] for h in range(H)], axis=0)
        v_p = jnp.concatenate(
            [qkv[:, 2 * D + h * Dh:2 * D + (h + 1) * Dh] for h in range(H)],
            axis=0)

        # ---- ONE block-diagonal score matmul + ONE PV matmul for ALL heads ----
        s_ = jax.lax.dot_general(bf16(q_p), bf16(k_p),
                                 (((1,), (1,)), ((), ())),
                                 preferred_element_type=f32)       # (H*BS, H*BS)
        s_ = s_ + big_mask
        s_ = s_ - jnp.max(s_, axis=-1, keepdims=True)   # batched row reductions
        p = jnp.exp(s_)
        p = p / jnp.sum(p, axis=-1, keepdims=True)      # exact softmax (parity)
        o_p = jnp.dot(bf16(p), bf16(v_p),
                      preferred_element_type=f32)                  # (H*BS, Dh)

        # ---- unpack heads back to (BS, D), column order (h, d) ----
        attn = jnp.concatenate(
            [o_p[h * BS:(h + 1) * BS, :] for h in range(H)], axis=1)

        # ---- out projection + residual + LayerNorm1 (post-norm) ----
        attn = jnp.dot(bf16(attn), w_out_ref[l],
                       preferred_element_type=f32) + b_out_ref[l]
        x = layernorm(x + attn, ln1_g_ref[l], ln1_b_ref[l])

        # ---- feed-forward (ReLU) + residual + LayerNorm2 ----
        h1 = jnp.dot(bf16(x), w1_ref[l], preferred_element_type=f32) + b1_ref[l]
        h1 = jnp.maximum(h1, 0.0)
        ff = jnp.dot(bf16(h1), w2_ref[l], preferred_element_type=f32) + b2_ref[l]
        x = layernorm(x + ff, ln2_g_ref[l], ln2_b_ref[l])

    # ---- decoder: lane-dense padded (BS, 128) slab, single unmasked store ----
    o_ref[...] = jnp.dot(bf16(x), dec_w_ref[...],
                         preferred_element_type=f32) + dec_b_ref[...]


# ----------------------------- params / glue --------------------------------

def make_positional_encoding(d_model, max_len=64):
    pos = jnp.arange(max_len, dtype=jnp.float32)[:, None]
    div = jnp.exp(jnp.arange(0, d_model, 2, dtype=jnp.float32)
                  * (-math.log(10000.0) / d_model))
    pe = jnp.zeros((max_len, d_model), jnp.float32)
    pe = pe.at[:, 0::2].set(jnp.sin(pos * div))
    pe = pe.at[:, 1::2].set(jnp.cos(pos * div))
    return pe  # (max_len, d_model)


def init_params(key, nfield, ntoken, ninp, nhead, nhid, nlayers):
    d_model = nfield * ninp
    dh = d_model // nhead
    q_scale = 1.0 / math.sqrt(dh)   # softmax scale, folded into the Q weights
    keys = jax.random.split(key, 4 * nlayers + 2)

    def nrm(k, shape):
        return 0.05 * jax.random.normal(k, shape, jnp.float32)

    w_in = []
    for l in range(nlayers):
        w = nrm(keys[4 * l + 0], (d_model, 3 * d_model))
        w = w.at[:, :d_model].multiply(q_scale)       # fold 1/sqrt(Dh) into Q
        w_in.append(w)
    w_in = jnp.stack(w_in).astype(jnp.bfloat16)
    w_out = jnp.stack([nrm(keys[4 * l + 1], (d_model, d_model))
                       for l in range(nlayers)]).astype(jnp.bfloat16)
    w1 = jnp.stack([nrm(keys[4 * l + 2], (d_model, nhid))
                    for l in range(nlayers)]).astype(jnp.bfloat16)
    w2 = jnp.stack([nrm(keys[4 * l + 3], (nhid, d_model))
                    for l in range(nlayers)]).astype(jnp.bfloat16)

    dec_w = jax.random.uniform(keys[-2], (d_model, ntoken), jnp.float32,
                               -0.1, 0.1)
    dec_w = jnp.pad(dec_w, ((0, 0), (0, N_PAD - ntoken))).astype(jnp.bfloat16)

    emb = jax.random.uniform(keys[-1], (ntoken, ninp), jnp.float32, -0.1, 0.1)
    # Block-diagonal embedding table kron(I_F, emb) with sqrt(ninp) folded in;
    # the in-kernel one-hot matmul against it IS the embedding gather + scale.
    emb_blk = jnp.kron(jnp.eye(nfield, dtype=jnp.float32),
                       emb * math.sqrt(ninp))

    zeros = lambda *s: jnp.zeros(s, jnp.float32)
    return {
        "emb_blk": emb_blk,                            # (F*ntoken, d_model)
        "pe": make_positional_encoding(d_model),       # (max_len, d_model)
        "w_in": w_in, "b_in": zeros(nlayers, 1, 3 * d_model),
        "w_out": w_out, "b_out": zeros(nlayers, 1, d_model),
        "w1": w1, "b1": zeros(nlayers, 1, nhid),
        "w2": w2, "b2": zeros(nlayers, 1, d_model),
        "ln1_g": jnp.ones((nlayers, 1, d_model), jnp.float32),
        "ln1_b": zeros(nlayers, 1, d_model),
        "ln2_g": jnp.ones((nlayers, 1, d_model), jnp.float32),
        "ln2_b": zeros(nlayers, 1, d_model),
        "dec_w": dec_w,                                # (d_model, 128) padded
        "dec_b": zeros(1, N_PAD),                      # padded decoder bias
    }


def forward(params, src_ids, src_mask, *, nhead, ntoken, ninp):
    B, S, F = src_ids.shape
    d_model = F * ninp
    Dh = d_model // nhead
    nlayers = params["w_in"].shape[0]
    nhid = params["w1"].shape[-1]
    G = B * nhead                         # number of (batch, head) blocks

    ids2d = src_ids.reshape(B * S, F).astype(jnp.int32)

    # Block-diagonal (G*S, G*S) additive mask: src_mask on every diagonal
    # block, -1e30 on cross-(batch, head) blocks (exp underflows to exact 0,
    # so per-head softmax normalisation is unchanged).
    m = jnp.maximum(src_mask.astype(jnp.float32), MASK_NEG)   # -inf -> -1e30
    eye = jnp.eye(G, dtype=bool)
    big_mask = jnp.where(eye[:, None, :, None], m[None, :, None, :], MASK_NEG)
    big_mask = big_mask.reshape(G * S, G * S)

    kernel = functools.partial(
        _fused_transformer_kernel,
        B=B, S=S, F=F, H=nhead, Dh=Dh, ntoken=ntoken, nlayers=nlayers)

    operands = (
        ids2d, big_mask, params["emb_blk"], params["pe"],
        params["w_in"], params["b_in"], params["w_out"], params["b_out"],
        params["w1"], params["b1"], params["w2"], params["b2"],
        params["ln1_g"], params["ln1_b"], params["ln2_g"], params["ln2_b"],
        params["dec_w"], params["dec_b"])

    # Advisory cost estimate so XLA schedules the surrounding tiny ops well.
    flops = 2 * B * S * (F * ntoken) * d_model                         # embed
    flops += nlayers * 2 * B * S * d_model * (4 * d_model + 2 * nhid)  # proj+FFN
    flops += nlayers * 4 * (G * S) * (G * S) * Dh                      # attention
    flops += 2 * B * S * d_model * N_PAD                               # decoder
    bytes_accessed = sum(int(a.size) * a.dtype.itemsize for a in operands)
    bytes_accessed += B * S * N_PAD * 4
    cost = pl.CostEstimate(flops=int(flops),
                           transcendentals=int(nlayers * (G * S) ** 2),
                           bytes_accessed=int(bytes_accessed))

    out_pad = pl.pallas_call(
        kernel,
        out_shape=jax.ShapeDtypeStruct((B * S, N_PAD), jnp.float32),
        in_specs=[pl.BlockSpec(memory_space=pltpu.MemorySpace.VMEM)]
                 * len(operands),
        out_specs=pl.BlockSpec(memory_space=pltpu.MemorySpace.VMEM),
        cost_estimate=cost,
    )(*operands)

    # Slice lane padding; return PyTorch's (S, B, ntoken) seq-first layout.
    return out_pad[:, :ntoken].reshape(B, S, ntoken).transpose(1, 0, 2)


def square_subsequent_mask(sz):
    # 0 where attending allowed (lower triangle), large-negative elsewhere
    # (-1e30 underflows to exact zeros after the max-subtracted softmax).
    allowed = jnp.tril(jnp.ones((sz, sz), bool))
    return jnp.where(allowed, 0.0, MASK_NEG).astype(jnp.float32)


if __name__ == "__main__":
    nfield, ntoken, ninp, nhead, nhid, nlayers = 4, 16, 8, 4, 64, 2
    B, S = 2, 8

    key = jax.random.PRNGKey(0)
    pkey, dkey = jax.random.split(key)
    params = init_params(pkey, nfield, ntoken, ninp, nhead, nhid, nlayers)

    src = jax.random.randint(dkey, (B, S, nfield), 0, ntoken, dtype=jnp.int32)
    src_mask = square_subsequent_mask(S)

    fwd = jax.jit(functools.partial(forward, nhead=nhead, ntoken=ntoken,
                                    ninp=ninp))
    out = jax.block_until_ready(fwd(params, src, src_mask))
    assert out.shape == (S, B, ntoken)
    assert bool(jnp.all(jnp.isfinite(out)))
    print("KERNEL_OK")
</pallas_src>

<mosaic_0001>
module attributes {stable_mosaic.version = 11 : i64} {
  func.func @_fused_transformer_kernel(%arg0: memref<16x4xi32, #tpu.memory_space<vmem>>, %arg1: memref<64x64xf32, #tpu.memory_space<vmem>>, %arg2: memref<64x32xf32, #tpu.memory_space<vmem>>, %arg3: memref<64x32xf32, #tpu.memory_space<vmem>>, %arg4: memref<2x32x96xbf16, #tpu.memory_space<vmem>>, %arg5: memref<2x1x96xf32, #tpu.memory_space<vmem>>, %arg6: memref<2x32x32xbf16, #tpu.memory_space<vmem>>, %arg7: memref<2x1x32xf32, #tpu.memory_space<vmem>>, %arg8: memref<2x32x64xbf16, #tpu.memory_space<vmem>>, %arg9: memref<2x1x64xf32, #tpu.memory_space<vmem>>, %arg10: memref<2x64x32xbf16, #tpu.memory_space<vmem>>, %arg11: memref<2x1x32xf32, #tpu.memory_space<vmem>>, %arg12: memref<2x1x32xf32, #tpu.memory_space<vmem>>, %arg13: memref<2x1x32xf32, #tpu.memory_space<vmem>>, %arg14: memref<2x1x32xf32, #tpu.memory_space<vmem>>, %arg15: memref<2x1x32xf32, #tpu.memory_space<vmem>>, %arg16: memref<32x128xbf16, #tpu.memory_space<vmem>>, %arg17: memref<1x128xf32, #tpu.memory_space<vmem>>, %arg18: memref<16x128xf32, #tpu.memory_space<vmem>>) attributes {dimension_semantics = [], scalar_prefetch = 0 : i64, scratch_operands = 0 : i64, tpu.core_type = #tpu.core_type<tc>} {
    %c0 = arith.constant 0 : index
    %c0_0 = arith.constant 0 : index
    %0 = vector.load %arg0[%c0, %c0_0] : memref<16x4xi32, #tpu.memory_space<vmem>>, vector<16x4xi32>
    %1 = tpu.iota {dimensions = array<i32: 1>} : vector<16x16xi32>
    %2 = vector.extract_strided_slice %0 {offsets = [0, 0], sizes = [16, 1], strides = [1, 1]} : vector<16x4xi32> to vector<16x1xi32>
    %3 = vector.broadcast %2 : vector<16x1xi32> to vector<16x16xi32>
    %4 = arith.cmpi eq, %3, %1 : vector<16x16xi32>
    %5 = arith.extui %4 : vector<16x16xi1> to vector<16x16xi32>
    %6 = arith.sitofp %5 : vector<16x16xi32> to vector<16x16xf32>
    %7 = vector.extract_strided_slice %0 {offsets = [0, 1], sizes = [16, 1], strides = [1, 1]} : vector<16x4xi32> to vector<16x1xi32>
    %8 = vector.broadcast %7 : vector<16x1xi32> to vector<16x16xi32>
    %9 = arith.cmpi eq, %8, %1 : vector<16x16xi32>
    %10 = arith.extui %9 : vector<16x16xi1> to vector<16x16xi32>
    %11 = arith.sitofp %10 : vector<16x16xi32> to vector<16x16xf32>
    %12 = vector.extract_strided_slice %0 {offsets = [0, 2], sizes = [16, 1], strides = [1, 1]} : vector<16x4xi32> to vector<16x1xi32>
    %13 = vector.broadcast %12 : vector<16x1xi32> to vector<16x16xi32>
    %14 = arith.cmpi eq, %13, %1 : vector<16x16xi32>
    %15 = arith.extui %14 : vector<16x16xi1> to vector<16x16xi32>
    %16 = arith.sitofp %15 : vector<16x16xi32> to vector<16x16xf32>
    %17 = vector.extract_strided_slice %0 {offsets = [0, 3], sizes = [16, 1], strides = [1, 1]} : vector<16x4xi32> to vector<16x1xi32>
    %18 = vector.broadcast %17 : vector<16x1xi32> to vector<16x16xi32>
    %19 = arith.cmpi eq, %18, %1 : vector<16x16xi32>
    %20 = arith.extui %19 : vector<16x16xi1> to vector<16x16xi32>
    %21 = arith.sitofp %20 : vector<16x16xi32> to vector<16x16xf32>
    %22 = tpu.concatenate %6, %11, %16, %21 in 1 : vector<16x16xf32>, vector<16x16xf32>, vector<16x16xf32>, vector<16x16xf32> -> vector<16x64xf32>
    %c0_1 = arith.constant 0 : index
    %c0_2 = arith.constant 0 : index
    %23 = vector.load %arg2[%c0_1, %c0_2] : memref<64x32xf32, #tpu.memory_space<vmem>>, vector<64x32xf32>
    %cst = arith.constant dense<0.000000e+00> : vector<16x32xf32>
    %24 = tpu.matmul %22, %23, %cst {dimension_numbers = #tpu.dot_dimension_numbers<[1], [0], [0], [1], [0, 0, 1, 1], [], []>} : vector<16x64xf32>, vector<64x32xf32>, vector<16x32xf32> -> vector<16x32xf32>
    %c0_3 = arith.constant 0 : index
    %c0_4 = arith.constant 0 : index
    %25 = vector.load %arg3[%c0_3, %c0_4] : memref<64x32xf32, #tpu.memory_space<vmem>>, vector<8x32xf32>
    %26 = tpu.concatenate %25, %25 in 0 : vector<8x32xf32>, vector<8x32xf32> -> vector<16x32xf32>
    %27 = arith.addf %24, %26 : vector<16x32xf32>
    %c0_5 = arith.constant 0 : index
    %c0_6 = arith.constant 0 : index
    %28 = vector.load %arg1[%c0_5, %c0_6] : memref<64x64xf32, #tpu.memory_space<vmem>>, vector<64x64xf32>
    %29 = arith.truncf %27 : vector<16x32xf32> to vector<16x32xbf16>
    %c0_7 = arith.constant 0 : index
    %c0_8 = arith.constant 0 : index
    %c0_9 = arith.constant 0 : index
    %30 = vector.load %arg4[%c0_7, %c0_8, %c0_9] : memref<2x32x96xbf16, #tpu.memory_space<vmem>>, vector<1x32x96xbf16>
    %31 = vector.shape_cast %30 : vector<1x32x96xbf16> to vector<32x96xbf16>
    %cst_10 = arith.constant dense<0.000000e+00> : vector<16x96xf32>
    %32 = tpu.matmul %29, %31, %cst_10 {dimension_numbers = #tpu.dot_dimension_numbers<[1], [0], [0], [1], [0, 0, 1, 1], [], []>} : vector<16x32xbf16>, vector<32x96xbf16>, vector<16x96xf32> -> vector<16x96xf32>
    %c0_11 = arith.constant 0 : index
    %c0_12 = arith.constant 0 : index
    %c0_13 = arith.constant 0 : index
    %33 = vector.load %arg5[%c0_11, %c0_12, %c0_13] : memref<2x1x96xf32, #tpu.memory_space<vmem>>, vector<1x1x96xf32>
    %34 = vector.shape_cast %33 : vector<1x1x96xf32> to vector<1x96xf32>
    %35 = vector.broadcast %34 : vector<1x96xf32> to vector<16x96xf32>
    %36 = arith.addf %32, %35 : vector<16x96xf32>
    %37 = vector.extract_strided_slice %36 {offsets = [0, 0], sizes = [16, 8], strides = [1, 1]} : vector<16x96xf32> to vector<16x8xf32>
    %38 = vector.extract_strided_slice %36 {offsets = [0, 8], sizes = [16, 8], strides = [1, 1]} : vector<16x96xf32> to vector<16x8xf32>
    %39 = vector.extract_strided_slice %36 {offsets = [0, 16], sizes = [16, 8], strides = [1, 1]} : vector<16x96xf32> to vector<16x8xf32>
    %40 = vector.extract_strided_slice %36 {offsets = [0, 24], sizes = [16, 8], strides = [1, 1]} : vector<16x96xf32> to vector<16x8xf32>
    %41 = tpu.concatenate %37, %38, %39, %40 in 0 : vector<16x8xf32>, vector<16x8xf32>, vector<16x8xf32>, vector<16x8xf32> -> vector<64x8xf32>
    %42 = vector.extract_strided_slice %36 {offsets = [0, 32], sizes = [16, 8], strides = [1, 1]} : vector<16x96xf32> to vector<16x8xf32>
    %43 = vector.extract_strided_slice %36 {offsets = [0, 40], sizes = [16, 8], strides = [1, 1]} : vector<16x96xf32> to vector<16x8xf32>
    %44 = vector.extract_strided_slice %36 {offsets = [0, 48], sizes = [16, 8], strides = [1, 1]} : vector<16x96xf32> to vector<16x8xf32>
    %45 = vector.extract_strided_slice %36 {offsets = [0, 56], sizes = [16, 8], strides = [1, 1]} : vector<16x96xf32> to vector<16x8xf32>
    %46 = tpu.concatenate %42, %43, %44, %45 in 0 : vector<16x8xf32>, vector<16x8xf32>, vector<16x8xf32>, vector<16x8xf32> -> vector<64x8xf32>
    %47 = vector.extract_strided_slice %36 {offsets = [0, 64], sizes = [16, 8], strides = [1, 1]} : vector<16x96xf32> to vector<16x8xf32>
    %48 = vector.extract_strided_slice %36 {offsets = [0, 72], sizes = [16, 8], strides = [1, 1]} : vector<16x96xf32> to vector<16x8xf32>
    %49 = vector.extract_strided_slice %36 {offsets = [0, 80], sizes = [16, 8], strides = [1, 1]} : vector<16x96xf32> to vector<16x8xf32>
    %50 = vector.extract_strided_slice %36 {offsets = [0, 88], sizes = [16, 8], strides = [1, 1]} : vector<16x96xf32> to vector<16x8xf32>
    %51 = tpu.concatenate %47, %48, %49, %50 in 0 : vector<16x8xf32>, vector<16x8xf32>, vector<16x8xf32>, vector<16x8xf32> -> vector<64x8xf32>
    %52 = arith.truncf %41 : vector<64x8xf32> to vector<64x8xbf16>
    %53 = arith.truncf %46 : vector<64x8xf32> to vector<64x8xbf16>
    %cst_14 = arith.constant dense<0.000000e+00> : vector<64x64xf32>
    %54 = tpu.matmul %52, %53, %cst_14 {dimension_numbers = #tpu.dot_dimension_numbers<[1], [1], [0], [0], [0, 0, 1, 0], [], []>} : vector<64x8xbf16>, vector<64x8xbf16>, vector<64x64xf32> -> vector<64x64xf32>
    %55 = arith.addf %54, %28 : vector<64x64xf32>
    %cst_15 = arith.constant dense<0xFF800000> : vector<64xf32>
    %56 = vector.multi_reduction <maximumf>, %55, %cst_15 [1] : vector<64x64xf32> to vector<64xf32>
    %57 = vector.shape_cast %56 : vector<64xf32> to vector<64x1xf32>
    %58 = vector.broadcast %57 : vector<64x1xf32> to vector<64x64xf32>
    %59 = arith.subf %55, %58 : vector<64x64xf32>
    %60 = math.exp %59 : vector<64x64xf32>
    %cst_16 = arith.constant dense<0.000000e+00> : vector<64xf32>
    %61 = vector.multi_reduction <add>, %60, %cst_16 [1] : vector<64x64xf32> to vector<64xf32>
    %62 = vector.shape_cast %61 : vector<64xf32> to vector<64x1xf32>
    %63 = vector.broadcast %62 : vector<64x1xf32> to vector<64x64xf32>
    %64 = arith.divf %60, %63 : vector<64x64xf32>
    %65 = arith.truncf %64 : vector<64x64xf32> to vector<64x64xbf16>
    %66 = arith.truncf %51 : vector<64x8xf32> to vector<64x8xbf16>
    %cst_17 = arith.constant dense<0.000000e+00> : vector<64x8xf32>
    %67 = tpu.matmul %65, %66, %cst_17 {dimension_numbers = #tpu.dot_dimension_numbers<[1], [0], [0], [1], [0, 0, 1, 1], [], []>} : vector<64x64xbf16>, vector<64x8xbf16>, vector<64x8xf32> -> vector<64x8xf32>
    %68 = vector.extract_strided_slice %67 {offsets = [0, 0], sizes = [16, 8], strides = [1, 1]} : vector<64x8xf32> to vector<16x8xf32>
    %69 = vector.extract_strided_slice %67 {offsets = [16, 0], sizes = [16, 8], strides = [1, 1]} : vector<64x8xf32> to vector<16x8xf32>
    %70 = vector.extract_strided_slice %67 {offsets = [32, 0], sizes = [16, 8], strides = [1, 1]} : vector<64x8xf32> to vector<16x8xf32>
    %71 = vector.extract_strided_slice %67 {offsets = [48, 0], sizes = [16, 8], strides = [1, 1]} : vector<64x8xf32> to vector<16x8xf32>
    %72 = tpu.concatenate %68, %69, %70, %71 in 1 : vector<16x8xf32>, vector<16x8xf32>, vector<16x8xf32>, vector<16x8xf32> -> vector<16x32xf32>
    %73 = arith.truncf %72 : vector<16x32xf32> to vector<16x32xbf16>
    %c0_18 = arith.constant 0 : index
    %c0_19 = arith.constant 0 : index
    %c0_20 = arith.constant 0 : index
    %74 = vector.load %arg6[%c0_18, %c0_19, %c0_20] : memref<2x32x32xbf16, #tpu.memory_space<vmem>>, vector<1x32x32xbf16>
    %75 = vector.shape_cast %74 : vector<1x32x32xbf16> to vector<32x32xbf16>
    %cst_21 = arith.constant dense<0.000000e+00> : vector<16x32xf32>
    %76 = tpu.matmul %73, %75, %cst_21 {dimension_numbers = #tpu.dot_dimension_numbers<[1], [0], [0], [1], [0, 0, 1, 1], [], []>} : vector<16x32xbf16>, vector<32x32xbf16>, vector<16x32xf32> -> vector<16x32xf32>
    %c0_22 = arith.constant 0 : index
    %c0_23 = arith.constant 0 : index
    %c0_24 = arith.constant 0 : index
    %77 = vector.load %arg7[%c0_22, %c0_23, %c0_24] : memref<2x1x32xf32, #tpu.memory_space<vmem>>, vector<1x1x32xf32>
    %78 = vector.shape_cast %77 : vector<1x1x32xf32> to vector<1x32xf32>
    %79 = vector.broadcast %78 : vector<1x32xf32> to vector<16x32xf32>
    %80 = arith.addf %76, %79 : vector<16x32xf32>
    %81 = arith.addf %27, %80 : vector<16x32xf32>
    %c0_25 = arith.constant 0 : index
    %c0_26 = arith.constant 0 : index
    %c0_27 = arith.constant 0 : index
    %82 = vector.load %arg12[%c0_25, %c0_26, %c0_27] : memref<2x1x32xf32, #tpu.memory_space<vmem>>, vector<1x1x32xf32>
    %83 = vector.shape_cast %82 : vector<1x1x32xf32> to vector<1x32xf32>
    %c0_28 = arith.constant 0 : index
    %c0_29 = arith.constant 0 : index
    %c0_30 = arith.constant 0 : index
    %84 = vector.load %arg13[%c0_28, %c0_29, %c0_30] : memref<2x1x32xf32, #tpu.memory_space<vmem>>, vector<1x1x32xf32>
    %85 = vector.shape_cast %84 : vector<1x1x32xf32> to vector<1x32xf32>
    %cst_31 = arith.constant dense<0.000000e+00> : vector<16xf32>
    %86 = vector.multi_reduction <add>, %81, %cst_31 [1] : vector<16x32xf32> to vector<16xf32>
    %87 = vector.shape_cast %86 : vector<16xf32> to vector<16x1xf32>
    %cst_32 = arith.constant 3.200000e+01 : f32
    %88 = vector.broadcast %cst_32 : f32 to vector<16x1xf32>
    %89 = arith.divf %87, %88 : vector<16x1xf32>
    %90 = vector.broadcast %89 : vector<16x1xf32> to vector<16x32xf32>
    %91 = arith.subf %81, %90 : vector<16x32xf32>
    %92 = vector.broadcast %89 : vector<16x1xf32> to vector<16x32xf32>
    %93 = arith.subf %81, %92 : vector<16x32xf32>
    %94 = arith.mulf %91, %93 : vector<16x32xf32>
    %cst_33 = arith.constant dense<0.000000e+00> : vector<16xf32>
    %95 = vector.multi_reduction <add>, %94, %cst_33 [1] : vector<16x32xf32> to vector<16xf32>
    %96 = vector.shape_cast %95 : vector<16xf32> to vector<16x1xf32>
    %cst_34 = arith.constant 3.200000e+01 : f32
    %97 = vector.broadcast %cst_34 : f32 to vector<16x1xf32>
    %98 = arith.divf %96, %97 : vector<16x1xf32>
    %99 = vector.broadcast %89 : vector<16x1xf32> to vector<16x32xf32>
    %100 = arith.subf %81, %99 : vector<16x32xf32>
    %cst_35 = arith.constant 9.99999974E-6 : f32
    %101 = vector.broadcast %cst_35 : f32 to vector<16x1xf32>
    %102 = arith.addf %98, %101 : vector<16x1xf32>
    %103 = math.rsqrt %102 : vector<16x1xf32>
    %104 = vector.broadcast %103 : vector<16x1xf32> to vector<16x32xf32>
    %105 = arith.mulf %100, %104 : vector<16x32xf32>
    %106 = vector.broadcast %83 : vector<1x32xf32> to vector<16x32xf32>
    %107 = arith.mulf %105, %106 : vector<16x32xf32>
    %108 = vector.broadcast %85 : vector<1x32xf32> to vector<16x32xf32>
    %109 = arith.addf %107, %108 : vector<16x32xf32>
    %110 = arith.truncf %109 : vector<16x32xf32> to vector<16x32xbf16>
    %c0_36 = arith.constant 0 : index
    %c0_37 = arith.constant 0 : index
    %c0_38 = arith.constant 0 : index
    %111 = vector.load %arg8[%c0_36, %c0_37, %c0_38] : memref<2x32x64xbf16, #tpu.memory_space<vmem>>, vector<1x32x64xbf16>
    %112 = vector.shape_cast %111 : vector<1x32x64xbf16> to vector<32x64xbf16>
    %cst_39 = arith.constant dense<0.000000e+00> : vector<16x64xf32>
    %113 = tpu.matmul %110, %112, %cst_39 {dimension_numbers = #tpu.dot_dimension_numbers<[1], [0], [0], [1], [0, 0, 1, 1], [], []>} : vector<16x32xbf16>, vector<32x64xbf16>, vector<16x64xf32> -> vector<16x64xf32>
    %c0_40 = arith.constant 0 : index
    %c0_41 = arith.constant 0 : index
    %c0_42 = arith.constant 0 : index
    %114 = vector.load %arg9[%c0_40, %c0_41, %c0_42] : memref<2x1x64xf32, #tpu.memory_space<vmem>>, vector<1x1x64xf32>
    %115 = vector.shape_cast %114 : vector<1x1x64xf32> to vector<1x64xf32>
    %116 = vector.broadcast %115 : vector<1x64xf32> to vector<16x64xf32>
    %117 = arith.addf %113, %116 : vector<16x64xf32>
    %cst_43 = arith.constant 0.000000e+00 : f32
    %118 = vector.broadcast %cst_43 : f32 to vector<16x64xf32>
    %119 = arith.maximumf %117, %118 : vector<16x64xf32>
    %120 = arith.truncf %119 : vector<16x64xf32> to vector<16x64xbf16>
    %c0_44 = arith.constant 0 : index
    %c0_45 = arith.constant 0 : index
    %c0_46 = arith.constant 0 : index
    %121 = vector.load %arg10[%c0_44, %c0_45, %c0_46] : memref<2x64x32xbf16, #tpu.memory_space<vmem>>, vector<1x64x32xbf16>
    %122 = vector.shape_cast %121 : vector<1x64x32xbf16> to vector<64x32xbf16>
    %cst_47 = arith.constant dense<0.000000e+00> : vector<16x32xf32>
    %123 = tpu.matmul %120, %122, %cst_47 {dimension_numbers = #tpu.dot_dimension_numbers<[1], [0], [0], [1], [0, 0, 1, 1], [], []>} : vector<16x64xbf16>, vector<64x32xbf16>, vector<16x32xf32> -> vector<16x32xf32>
    %c0_48 = arith.constant 0 : index
    %c0_49 = arith.constant 0 : index
    %c0_50 = arith.constant 0 : index
    %124 = vector.load %arg11[%c0_48, %c0_49, %c0_50] : memref<2x1x32xf32, #tpu.memory_space<vmem>>, vector<1x1x32xf32>
    %125 = vector.shape_cast %124 : vector<1x1x32xf32> to vector<1x32xf32>
    %126 = vector.broadcast %125 : vector<1x32xf32> to vector<16x32xf32>
    %127 = arith.addf %123, %126 : vector<16x32xf32>
    %128 = arith.addf %109, %127 : vector<16x32xf32>
    %c0_51 = arith.constant 0 : index
    %c0_52 = arith.constant 0 : index
    %c0_53 = arith.constant 0 : index
    %129 = vector.load %arg14[%c0_51, %c0_52, %c0_53] : memref<2x1x32xf32, #tpu.memory_space<vmem>>, vector<1x1x32xf32>
    %130 = vector.shape_cast %129 : vector<1x1x32xf32> to vector<1x32xf32>
    %c0_54 = arith.constant 0 : index
    %c0_55 = arith.constant 0 : index
    %c0_56 = arith.constant 0 : index
    %131 = vector.load %arg15[%c0_54, %c0_55, %c0_56] : memref<2x1x32xf32, #tpu.memory_space<vmem>>, vector<1x1x32xf32>
    %132 = vector.shape_cast %131 : vector<1x1x32xf32> to vector<1x32xf32>
    %cst_57 = arith.constant dense<0.000000e+00> : vector<16xf32>
    %133 = vector.multi_reduction <add>, %128, %cst_57 [1] : vector<16x32xf32> to vector<16xf32>
    %134 = vector.shape_cast %133 : vector<16xf32> to vector<16x1xf32>
    %cst_58 = arith.constant 3.200000e+01 : f32
    %135 = vector.broadcast %cst_58 : f32 to vector<16x1xf32>
    %136 = arith.divf %134, %135 : vector<16x1xf32>
    %137 = vector.broadcast %136 : vector<16x1xf32> to vector<16x32xf32>
    %138 = arith.subf %128, %137 : vector<16x32xf32>
    %139 = vector.broadcast %136 : vector<16x1xf32> to vector<16x32xf32>
    %140 = arith.subf %128, %139 : vector<16x32xf32>
    %141 = arith.mulf %138, %140 : vector<16x32xf32>
    %cst_59 = arith.constant dense<0.000000e+00> : vector<16xf32>
    %142 = vector.multi_reduction <add>, %141, %cst_59 [1] : vector<16x32xf32> to vector<16xf32>
    %143 = vector.shape_cast %142 : vector<16xf32> to vector<16x1xf32>
    %cst_60 = arith.constant 3.200000e+01 : f32
    %144 = vector.broadcast %cst_60 : f32 to vector<16x1xf32>
    %145 = arith.divf %143, %144 : vector<16x1xf32>
    %146 = vector.broadcast %136 : vector<16x1xf32> to vector<16x32xf32>
    %147 = arith.subf %128, %146 : vector<16x32xf32>
    %cst_61 = arith.constant 9.99999974E-6 : f32
    %148 = vector.broadcast %cst_61 : f32 to vector<16x1xf32>
    %149 = arith.addf %145, %148 : vector<16x1xf32>
    %150 = math.rsqrt %149 : vector<16x1xf32>
    %151 = vector.broadcast %150 : vector<16x1xf32> to vector<16x32xf32>
    %152 = arith.mulf %147, %151 : vector<16x32xf32>
    %153 = vector.broadcast %130 : vector<1x32xf32> to vector<16x32xf32>
    %154 = arith.mulf %152, %153 : vector<16x32xf32>
    %155 = vector.broadcast %132 : vector<1x32xf32> to vector<16x32xf32>
    %156 = arith.addf %154, %155 : vector<16x32xf32>
    %157 = arith.truncf %156 : vector<16x32xf32> to vector<16x32xbf16>
    %c1 = arith.constant 1 : index
    %c0_62 = arith.constant 0 : index
    %c0_63 = arith.constant 0 : index
    %158 = vector.load %arg4[%c1, %c0_62, %c0_63] : memref<2x32x96xbf16, #tpu.memory_space<vmem>>, vector<1x32x96xbf16>
    %159 = vector.shape_cast %158 : vector<1x32x96xbf16> to vector<32x96xbf16>
    %cst_64 = arith.constant dense<0.000000e+00> : vector<16x96xf32>
    %160 = tpu.matmul %157, %159, %cst_64 {dimension_numbers = #tpu.dot_dimension_numbers<[1], [0], [0], [1], [0, 0, 1, 1], [], []>} : vector<16x32xbf16>, vector<32x96xbf16>, vector<16x96xf32> -> vector<16x96xf32>
    %c1_65 = arith.constant 1 : index
    %c0_66 = arith.constant 0 : index
    %c0_67 = arith.constant 0 : index
    %161 = vector.load %arg5[%c1_65, %c0_66, %c0_67] : memref<2x1x96xf32, #tpu.memory_space<vmem>>, vector<1x1x96xf32>
    %162 = vector.shape_cast %161 : vector<1x1x96xf32> to vector<1x96xf32>
    %163 = vector.broadcast %162 : vector<1x96xf32> to vector<16x96xf32>
    %164 = arith.addf %160, %163 : vector<16x96xf32>
    %165 = vector.extract_strided_slice %164 {offsets = [0, 0], sizes = [16, 8], strides = [1, 1]} : vector<16x96xf32> to vector<16x8xf32>
    %166 = vector.extract_strided_slice %164 {offsets = [0, 8], sizes = [16, 8], strides = [1, 1]} : vector<16x96xf32> to vector<16x8xf32>
    %167 = vector.extract_strided_slice %164 {offsets = [0, 16], sizes = [16, 8], strides = [1, 1]} : vector<16x96xf32> to vector<16x8xf32>
    %168 = vector.extract_strided_slice %164 {offsets = [0, 24], sizes = [16, 8], strides = [1, 1]} : vector<16x96xf32> to vector<16x8xf32>
    %169 = tpu.concatenate %165, %166, %167, %168 in 0 : vector<16x8xf32>, vector<16x8xf32>, vector<16x8xf32>, vector<16x8xf32> -> vector<64x8xf32>
    %170 = vector.extract_strided_slice %164 {offsets = [0, 32], sizes = [16, 8], strides = [1, 1]} : vector<16x96xf32> to vector<16x8xf32>
    %171 = vector.extract_strided_slice %164 {offsets = [0, 40], sizes = [16, 8], strides = [1, 1]} : vector<16x96xf32> to vector<16x8xf32>
    %172 = vector.extract_strided_slice %164 {offsets = [0, 48], sizes = [16, 8], strides = [1, 1]} : vector<16x96xf32> to vector<16x8xf32>
    %173 = vector.extract_strided_slice %164 {offsets = [0, 56], sizes = [16, 8], strides = [1, 1]} : vector<16x96xf32> to vector<16x8xf32>
    %174 = tpu.concatenate %170, %171, %172, %173 in 0 : vector<16x8xf32>, vector<16x8xf32>, vector<16x8xf32>, vector<16x8xf32> -> vector<64x8xf32>
    %175 = vector.extract_strided_slice %164 {offsets = [0, 64], sizes = [16, 8], strides = [1, 1]} : vector<16x96xf32> to vector<16x8xf32>
    %176 = vector.extract_strided_slice %164 {offsets = [0, 72], sizes = [16, 8], strides = [1, 1]} : vector<16x96xf32> to vector<16x8xf32>
    %177 = vector.extract_strided_slice %164 {offsets = [0, 80], sizes = [16, 8], strides = [1, 1]} : vector<16x96xf32> to vector<16x8xf32>
    %178 = vector.extract_strided_slice %164 {offsets = [0, 88], sizes = [16, 8], strides = [1, 1]} : vector<16x96xf32> to vector<16x8xf32>
    %179 = tpu.concatenate %175, %176, %177, %178 in 0 : vector<16x8xf32>, vector<16x8xf32>, vector<16x8xf32>, vector<16x8xf32> -> vector<64x8xf32>
    %180 = arith.truncf %169 : vector<64x8xf32> to vector<64x8xbf16>
    %181 = arith.truncf %174 : vector<64x8xf32> to vector<64x8xbf16>
    %cst_68 = arith.constant dense<0.000000e+00> : vector<64x64xf32>
    %182 = tpu.matmul %180, %181, %cst_68 {dimension_numbers = #tpu.dot_dimension_numbers<[1], [1], [0], [0], [0, 0, 1, 0], [], []>} : vector<64x8xbf16>, vector<64x8xbf16>, vector<64x64xf32> -> vector<64x64xf32>
    %183 = arith.addf %182, %28 : vector<64x64xf32>
    %cst_69 = arith.constant dense<0xFF800000> : vector<64xf32>
    %184 = vector.multi_reduction <maximumf>, %183, %cst_69 [1] : vector<64x64xf32> to vector<64xf32>
    %185 = vector.shape_cast %184 : vector<64xf32> to vector<64x1xf32>
    %186 = vector.broadcast %185 : vector<64x1xf32> to vector<64x64xf32>
    %187 = arith.subf %183, %186 : vector<64x64xf32>
    %188 = math.exp %187 : vector<64x64xf32>
    %cst_70 = arith.constant dense<0.000000e+00> : vector<64xf32>
    %189 = vector.multi_reduction <add>, %188, %cst_70 [1] : vector<64x64xf32> to vector<64xf32>
    %190 = vector.shape_cast %189 : vector<64xf32> to vector<64x1xf32>
    %191 = vector.broadcast %190 : vector<64x1xf32> to vector<64x64xf32>
    %192 = arith.divf %188, %191 : vector<64x64xf32>
    %193 = arith.truncf %192 : vector<64x64xf32> to vector<64x64xbf16>
    %194 = arith.truncf %179 : vector<64x8xf32> to vector<64x8xbf16>
    %cst_71 = arith.constant dense<0.000000e+00> : vector<64x8xf32>
    %195 = tpu.matmul %193, %194, %cst_71 {dimension_numbers = #tpu.dot_dimension_numbers<[1], [0], [0], [1], [0, 0, 1, 1], [], []>} : vector<64x64xbf16>, vector<64x8xbf16>, vector<64x8xf32> -> vector<64x8xf32>
    %196 = vector.extract_strided_slice %195 {offsets = [0, 0], sizes = [16, 8], strides = [1, 1]} : vector<64x8xf32> to vector<16x8xf32>
    %197 = vector.extract_strided_slice %195 {offsets = [16, 0], sizes = [16, 8], strides = [1, 1]} : vector<64x8xf32> to vector<16x8xf32>
    %198 = vector.extract_strided_slice %195 {offsets = [32, 0], sizes = [16, 8], strides = [1, 1]} : vector<64x8xf32> to vector<16x8xf32>
    %199 = vector.extract_strided_slice %195 {offsets = [48, 0], sizes = [16, 8], strides = [1, 1]} : vector<64x8xf32> to vector<16x8xf32>
    %200 = tpu.concatenate %196, %197, %198, %199 in 1 : vector<16x8xf32>, vector<16x8xf32>, vector<16x8xf32>, vector<16x8xf32> -> vector<16x32xf32>
    %201 = arith.truncf %200 : vector<16x32xf32> to vector<16x32xbf16>
    %c1_72 = arith.constant 1 : index
    %c0_73 = arith.constant 0 : index
    %c0_74 = arith.constant 0 : index
    %202 = vector.load %arg6[%c1_72, %c0_73, %c0_74] : memref<2x32x32xbf16, #tpu.memory_space<vmem>>, vector<1x32x32xbf16>
    %203 = vector.shape_cast %202 : vector<1x32x32xbf16> to vector<32x32xbf16>
    %cst_75 = arith.constant dense<0.000000e+00> : vector<16x32xf32>
    %204 = tpu.matmul %201, %203, %cst_75 {dimension_numbers = #tpu.dot_dimension_numbers<[1], [0], [0], [1], [0, 0, 1, 1], [], []>} : vector<16x32xbf16>, vector<32x32xbf16>, vector<16x32xf32> -> vector<16x32xf32>
    %c1_76 = arith.constant 1 : index
    %c0_77 = arith.constant 0 : index
    %c0_78 = arith.constant 0 : index
    %205 = vector.load %arg7[%c1_76, %c0_77, %c0_78] : memref<2x1x32xf32, #tpu.memory_space<vmem>>, vector<1x1x32xf32>
    %206 = vector.shape_cast %205 : vector<1x1x32xf32> to vector<1x32xf32>
    %207 = vector.broadcast %206 : vector<1x32xf32> to vector<16x32xf32>
    %208 = arith.addf %204, %207 : vector<16x32xf32>
    %209 = arith.addf %156, %208 : vector<16x32xf32>
    %c1_79 = arith.constant 1 : index
    %c0_80 = arith.constant 0 : index
    %c0_81 = arith.constant 0 : index
    %210 = vector.load %arg12[%c1_79, %c0_80, %c0_81] : memref<2x1x32xf32, #tpu.memory_space<vmem>>, vector<1x1x32xf32>
    %211 = vector.shape_cast %210 : vector<1x1x32xf32> to vector<1x32xf32>
    %c1_82 = arith.constant 1 : index
    %c0_83 = arith.constant 0 : index
    %c0_84 = arith.constant 0 : index
    %212 = vector.load %arg13[%c1_82, %c0_83, %c0_84] : memref<2x1x32xf32, #tpu.memory_space<vmem>>, vector<1x1x32xf32>
    %213 = vector.shape_cast %212 : vector<1x1x32xf32> to vector<1x32xf32>
    %cst_85 = arith.constant dense<0.000000e+00> : vector<16xf32>
    %214 = vector.multi_reduction <add>, %209, %cst_85 [1] : vector<16x32xf32> to vector<16xf32>
    %215 = vector.shape_cast %214 : vector<16xf32> to vector<16x1xf32>
    %cst_86 = arith.constant 3.200000e+01 : f32
    %216 = vector.broadcast %cst_86 : f32 to vector<16x1xf32>
    %217 = arith.divf %215, %216 : vector<16x1xf32>
    %218 = vector.broadcast %217 : vector<16x1xf32> to vector<16x32xf32>
    %219 = arith.subf %209, %218 : vector<16x32xf32>
    %220 = vector.broadcast %217 : vector<16x1xf32> to vector<16x32xf32>
    %221 = arith.subf %209, %220 : vector<16x32xf32>
    %222 = arith.mulf %219, %221 : vector<16x32xf32>
    %cst_87 = arith.constant dense<0.000000e+00> : vector<16xf32>
    %223 = vector.multi_reduction <add>, %222, %cst_87 [1] : vector<16x32xf32> to vector<16xf32>
    %224 = vector.shape_cast %223 : vector<16xf32> to vector<16x1xf32>
    %cst_88 = arith.constant 3.200000e+01 : f32
    %225 = vector.broadcast %cst_88 : f32 to vector<16x1xf32>
    %226 = arith.divf %224, %225 : vector<16x1xf32>
    %227 = vector.broadcast %217 : vector<16x1xf32> to vector<16x32xf32>
    %228 = arith.subf %209, %227 : vector<16x32xf32>
    %cst_89 = arith.constant 9.99999974E-6 : f32
    %229 = vector.broadcast %cst_89 : f32 to vector<16x1xf32>
    %230 = arith.addf %226, %229 : vector<16x1xf32>
    %231 = math.rsqrt %230 : vector<16x1xf32>
    %232 = vector.broadcast %231 : vector<16x1xf32> to vector<16x32xf32>
    %233 = arith.mulf %228, %232 : vector<16x32xf32>
    %234 = vector.broadcast %211 : vector<1x32xf32> to vector<16x32xf32>
    %235 = arith.mulf %233, %234 : vector<16x32xf32>
    %236 = vector.broadcast %213 : vector<1x32xf32> to vector<16x32xf32>
    %237 = arith.addf %235, %236 : vector<16x32xf32>
    %238 = arith.truncf %237 : vector<16x32xf32> to vector<16x32xbf16>
    %c1_90 = arith.constant 1 : index
    %c0_91 = arith.constant 0 : index
    %c0_92 = arith.constant 0 : index
    %239 = vector.load %arg8[%c1_90, %c0_91, %c0_92] : memref<2x32x64xbf16, #tpu.memory_space<vmem>>, vector<1x32x64xbf16>
    %240 = vector.shape_cast %239 : vector<1x32x64xbf16> to vector<32x64xbf16>
    %cst_93 = arith.constant dense<0.000000e+00> : vector<16x64xf32>
    %241 = tpu.matmul %238, %240, %cst_93 {dimension_numbers = #tpu.dot_dimension_numbers<[1], [0], [0], [1], [0, 0, 1, 1], [], []>} : vector<16x32xbf16>, vector<32x64xbf16>, vector<16x64xf32> -> vector<16x64xf32>
    %c1_94 = arith.constant 1 : index
    %c0_95 = arith.constant 0 : index
    %c0_96 = arith.constant 0 : index
    %242 = vector.load %arg9[%c1_94, %c0_95, %c0_96] : memref<2x1x64xf32, #tpu.memory_space<vmem>>, vector<1x1x64xf32>
    %243 = vector.shape_cast %242 : vector<1x1x64xf32> to vector<1x64xf32>
    %244 = vector.broadcast %243 : vector<1x64xf32> to vector<16x64xf32>
    %245 = arith.addf %241, %244 : vector<16x64xf32>
    %cst_97 = arith.constant 0.000000e+00 : f32
    %246 = vector.broadcast %cst_97 : f32 to vector<16x64xf32>
    %247 = arith.maximumf %245, %246 : vector<16x64xf32>
    %248 = arith.truncf %247 : vector<16x64xf32> to vector<16x64xbf16>
    %c1_98 = arith.constant 1 : index
    %c0_99 = arith.constant 0 : index
    %c0_100 = arith.constant 0 : index
    %249 = vector.load %arg10[%c1_98, %c0_99, %c0_100] : memref<2x64x32xbf16, #tpu.memory_space<vmem>>, vector<1x64x32xbf16>
    %250 = vector.shape_cast %249 : vector<1x64x32xbf16> to vector<64x32xbf16>
    %cst_101 = arith.constant dense<0.000000e+00> : vector<16x32xf32>
    %251 = tpu.matmul %248, %250, %cst_101 {dimension_numbers = #tpu.dot_dimension_numbers<[1], [0], [0], [1], [0, 0, 1, 1], [], []>} : vector<16x64xbf16>, vector<64x32xbf16>, vector<16x32xf32> -> vector<16x32xf32>
    %c1_102 = arith.constant 1 : index
    %c0_103 = arith.constant 0 : index
    %c0_104 = arith.constant 0 : index
    %252 = vector.load %arg11[%c1_102, %c0_103, %c0_104] : memref<2x1x32xf32, #tpu.memory_space<vmem>>, vector<1x1x32xf32>
    %253 = vector.shape_cast %252 : vector<1x1x32xf32> to vector<1x32xf32>
    %254 = vector.broadcast %253 : vector<1x32xf32> to vector<16x32xf32>
    %255 = arith.addf %251, %254 : vector<16x32xf32>
    %256 = arith.addf %237, %255 : vector<16x32xf32>
    %c1_105 = arith.constant 1 : index
    %c0_106 = arith.constant 0 : index
    %c0_107 = arith.constant 0 : index
    %257 = vector.load %arg14[%c1_105, %c0_106, %c0_107] : memref<2x1x32xf32, #tpu.memory_space<vmem>>, vector<1x1x32xf32>
    %258 = vector.shape_cast %257 : vector<1x1x32xf32> to vector<1x32xf32>
    %c1_108 = arith.constant 1 : index
    %c0_109 = arith.constant 0 : index
    %c0_110 = arith.constant 0 : index
    %259 = vector.load %arg15[%c1_108, %c0_109, %c0_110] : memref<2x1x32xf32, #tpu.memory_space<vmem>>, vector<1x1x32xf32>
    %260 = vector.shape_cast %259 : vector<1x1x32xf32> to vector<1x32xf32>
    %cst_111 = arith.constant dense<0.000000e+00> : vector<16xf32>
    %261 = vector.multi_reduction <add>, %256, %cst_111 [1] : vector<16x32xf32> to vector<16xf32>
    %262 = vector.shape_cast %261 : vector<16xf32> to vector<16x1xf32>
    %cst_112 = arith.constant 3.200000e+01 : f32
    %263 = vector.broadcast %cst_112 : f32 to vector<16x1xf32>
    %264 = arith.divf %262, %263 : vector<16x1xf32>
    %265 = vector.broadcast %264 : vector<16x1xf32> to vector<16x32xf32>
    %266 = arith.subf %256, %265 : vector<16x32xf32>
    %267 = vector.broadcast %264 : vector<16x1xf32> to vector<16x32xf32>
    %268 = arith.subf %256, %267 : vector<16x32xf32>
    %269 = arith.mulf %266, %268 : vector<16x32xf32>
    %cst_113 = arith.constant dense<0.000000e+00> : vector<16xf32>
    %270 = vector.multi_reduction <add>, %269, %cst_113 [1] : vector<16x32xf32> to vector<16xf32>
    %271 = vector.shape_cast %270 : vector<16xf32> to vector<16x1xf32>
    %cst_114 = arith.constant 3.200000e+01 : f32
    %272 = vector.broadcast %cst_114 : f32 to vector<16x1xf32>
    %273 = arith.divf %271, %272 : vector<16x1xf32>
    %274 = vector.broadcast %264 : vector<16x1xf32> to vector<16x32xf32>
    %275 = arith.subf %256, %274 : vector<16x32xf32>
    %cst_115 = arith.constant 9.99999974E-6 : f32
    %276 = vector.broadcast %cst_115 : f32 to vector<16x1xf32>
    %277 = arith.addf %273, %276 : vector<16x1xf32>
    %278 = math.rsqrt %277 : vector<16x1xf32>
    %279 = vector.broadcast %278 : vector<16x1xf32> to vector<16x32xf32>
    %280 = arith.mulf %275, %279 : vector<16x32xf32>
    %281 = vector.broadcast %258 : vector<1x32xf32> to vector<16x32xf32>
    %282 = arith.mulf %280, %281 : vector<16x32xf32>
    %283 = vector.broadcast %260 : vector<1x32xf32> to vector<16x32xf32>
    %284 = arith.addf %282, %283 : vector<16x32xf32>
    %285 = arith.truncf %284 : vector<16x32xf32> to vector<16x32xbf16>
    %c0_116 = arith.constant 0 : index
    %c0_117 = arith.constant 0 : index
    %286 = vector.load %arg16[%c0_116, %c0_117] : memref<32x128xbf16, #tpu.memory_space<vmem>>, vector<32x128xbf16>
    %cst_118 = arith.constant dense<0.000000e+00> : vector<16x128xf32>
    %287 = tpu.matmul %285, %286, %cst_118 {dimension_numbers = #tpu.dot_dimension_numbers<[1], [0], [0], [1], [0, 0, 1, 1], [], []>} : vector<16x32xbf16>, vector<32x128xbf16>, vector<16x128xf32> -> vector<16x128xf32>
    %c0_119 = arith.constant 0 : index
    %c0_120 = arith.constant 0 : index
    %288 = vector.load %arg17[%c0_119, %c0_120] : memref<1x128xf32, #tpu.memory_space<vmem>>, vector<1x128xf32>
    %289 = vector.broadcast %288 : vector<1x128xf32> to vector<16x128xf32>
    %290 = arith.addf %287, %289 : vector<16x128xf32>
    %c0_121 = arith.constant 0 : index
    %c0_122 = arith.constant 0 : index
    %291 = vector.load %arg18[%c0_121, %c0_122] : memref<16x128xf32, #tpu.memory_space<vmem>>, vector<16x128xf32>
    tpu.vector_store %arg18[%c0_121, %c0_122], %290 {strides = array<i32>} : memref<16x128xf32, #tpu.memory_space<vmem>>, vector<16x128xf32>,
    return
  }
}

</mosaic_0001>

<bundles_post_ra>
// kernel: forward.1
= control target key start
LH: loop header
LB: loop body
LE: loop exit
PB: predicated region body
PF: predicated region fallthrough
CT: control target
= control target key end

     0   :  { %v2315_v0 = vmov 2   ;;  %v2316_v1 = vmov 1   ;;  %v2317_v4 = vmov 0.0   ;;  %v2318_v5 = vmov 3   ;;  %s2320_s21 = smov 16   ;;  %s2322_s22 = smov 48   ;;  %s2881_s0 = inlined_call_operand.vmem [shape: s32[16,4], index: 0, kind: input, shape index: {}]   ;;  %s2882_s2 = inlined_call_operand.vmem [shape: f32[64,32], index: 2, kind: input, shape index: {}]   ;;  %s2883_s4 = inlined_call_operand.vmem [shape: bf16[2,32,96], index: 4, kind: input, shape index: {}]   ;;  %s2884_s3 = inlined_call_operand.vmem [shape: f32[64,32], index: 3, kind: input, shape index: {}]   ;;  %s2885_s5 = inlined_call_operand.vmem [shape: f32[2,1,96], index: 5, kind: input, shape index: {}]   ;;  %s2886_s1 = inlined_call_operand.vmem [shape: f32[64,64], index: 1, kind: input, shape index: {}]   ;;  %s2887_s6 = inlined_call_operand.vmem [shape: bf16[2,32,32], index: 6, kind: input, shape index: {}]   ;;  %s2888_s7 = inlined_call_operand.vmem [shape: f32[2,1,32], index: 7, kind: input, shape index: {}]   ;;  %s2889_s8 = inlined_call_operand.vmem [shape: bf16[2,32,64], index: 8, kind: input, shape index: {}]   ;;  %s2890_s10 = inlined_call_operand.vmem [shape: bf16[2,64,32], index: 10, kind: input, shape index: {}]   ;;  %s2891_s12 = inlined_call_operand.vmem [shape: f32[2,1,32], index: 12, kind: input, shape index: {}]   ;;  %s2892_s13 = inlined_call_operand.vmem [shape: f32[2,1,32], index: 13, kind: input, shape index: {}]   ;;  %s2893_s9 = inlined_call_operand.vmem [shape: f32[2,1,64], index: 9, kind: input, shape index: {}]   ;;  %s2894_s11 = inlined_call_operand.vmem [shape: f32[2,1,32], index: 11, kind: input, shape index: {}]   ;;  %s2895_s14 = inlined_call_operand.vmem [shape: f32[2,1,32], index: 14, kind: input, shape index: {}]   ;;  %s2896_s15 = inlined_call_operand.vmem [shape: f32[2,1,32], index: 15, kind: input, shape index: {}]   ;;  %s2897_s16 = inlined_call_operand.vmem [shape: bf16[32,128], index: 16, kind: input, shape index: {}]   ;;  %s2898_s17 = inlined_call_operand.vmem [shape: f32[1,128], index: 17, kind: input, shape index: {}]   ;;  %s2899_s18 = inlined_call_operand.vmem [shape: f32[16,128], index: 18, kind: output, shape index: {}]  }
   0x1   :  { %2903 = sst [smem:[#allocation2_spill]] %s2881_s0  ;;  %2132 = vset.pattern.permute.xlu1 %v2315_v0  ;;  %2131 = vset.pattern.permute.xlu0 %v2316_v1  ;;  %v2319_v8 = vmov 0   ;;  %v62_v11 = vlaneseq  ;;  %vm136_vm8 = vcmask 130048   ;;  %vm139_vm9 = vcmask 261120   ;;  %v153_v54 = vld [vmem:[%s2884_s3] sm:$0xff]  ;;  %s2324_s3 = smov 112  }
   0x2   :  { %2904 = sst [smem:[#allocation3_spill]] %s2882_s2  ;;  %1963 = vmatprep.subr.bf16.mxu1 %v2317_v4  ;;  %vm142_vm10 = vcmask 392192   ;;  %vm154_vm11 = vcmask 523264   ;;  %vm2323_vm12 = vmmov 0   ;;  %v1779_v60 = vld [vmem:[%s2885_s5] ss:$0 sm:$0xff] }
   0x3   :  { %2905 = sst [smem:[#allocation4_spill]] %s2883_s4  ;;  %v63_v14 = vand.u32 127, %v62_v11  ;;  %1967 = vmatprep.mubr.msk.bf16.mxu1 %vm2323_vm12, %v2317_v4  ;;  %vm348_vm13 = vcmask 64512   ;;  %s2325_s0 = smov 104   ;;  %vm647_vm14 = vcmask 195584  }
   0x4   :  { %s2906_s29 = sld [smem:[#allocation2_spill]]  ;;  %s2326_s19 = smov 120  }
   0x5   :  { %s2907_s20 = sld [smem:[#allocation3_spill]]  ;;  %s2327_s2 = smov 96  }
   0x6   :  { %s2908_s24 = sld [smem:[#allocation4_spill]]  ;;  %s2328_s27 = smov 64  }
   0xa   :  { %v60_v2 = vld [vmem:[%s2906_s29] sm:$0xff]  ;;  %v61_v3 = vld [vmem:[%s2906_s29 + $0x8] sm:$0xff] }
   0xb   :  { %89 = vperm.xlu1 %2132, %v60_v2   ;;  %77 = vperm.xlu0 %2131, %v60_v2   ;;  %v152_v6 = vld [vmem:[%s2907_s20 + $0x38] sm:$0xff]  ;;  %v151_v7 = vld [vmem:[%s2907_s20 + $0x30] sm:$0xff]  ;;  %v150_v9 = vld [vmem:[%s2907_s20 + $0x28] sm:$0xff] }
   0xc   :  { %1944 = vmatprep.subr.mxu0 %v152_v6  ;;  %v149_v10 = vld [vmem:[%s2907_s20 + $0x20] sm:$0xff]  ;;  %v148_v12 = vld [vmem:[%s2907_s20 + $0x18] sm:$0xff]  ;;  %v147_v13 = vld [vmem:[%s2907_s20 + $0x10] sm:$0xff] }
   0xd   :  { %1945 = vmatpush3.msra.mxu0 %v152_v6  ;;  %v146_v17 = vld [vmem:[%s2907_s20 + $0x8] sm:$0xff]  ;;  %v145_v18 = vld [vmem:[%s2907_s20] sm:$0xff]  ;;  %s2321_s20 = smov 32  }
   0xe   :  { %1946 = vmatprep.subr.mxu0 %v151_v7  ;;  %v2213_v51 = vld [vmem:[%s2908_s24 + $0x8] sm:$0xff]   ;;  %v2214_v52 = vld [vmem:[%s2908_s24] sm:$0xff]  }
   0xf   :  { %92 = vperm.xlu1 %2132, %v61_v3   ;;  %80 = vperm.xlu0 %2131, %v61_v3  }
  0x10   :  { %1947 = vmatpush3.msra.mxu0 %v151_v7  ;;  %1964 = vmatpush3.bf16.msra.mxu1 %v2213_v51 }
  0x11   :  { %1948 = vmatprep.subr.mxu0 %v150_v9  ;;  %1965 = vmatprep.subr.bf16.mxu1 %v2317_v4 }
  0x12   :  { %1949 = vmatpush3.msra.mxu0 %v150_v9 }
  0x13   :  { %2134 = vset.pattern.permute.xlu1 %v2318_v5  ;;  %2133 = vset.pattern.permute.xlu0 %v2318_v5 }
  0x14   :  { %104 = vperm.xlu1 %2134, %v61_v3   ;;  %101 = vperm.xlu0 %2133, %v60_v2  }
  0x15   :  { %1950 = vmatprep.subr.mxu0 %v149_v10  ;;  %1966 = vmatpush3.bf16.msra.mxu1 %v2214_v52 }
  0x16   :  { %1951 = vmatpush3.msra.mxu0 %v149_v10 }
  0x17   :  { %1952 = vmatprep.subr.mxu0 %v148_v12 }
  0x18   :  { %2135 = vset.pattern.permute.xlu1 %v2319_v8  ;;  %2136 = vset.pattern.permute.xlu0 %v2319_v8 }
  0x19   :  { %65 = vperm.xlu1 %2135, %v60_v2   ;;  %68 = vperm.xlu0 %2136, %v61_v3  }
  0x1a   :  { %1953 = vmatpush3.msra.mxu0 %v148_v12 }
  0x1b   :  { %1954 = vmatprep.subr.mxu0 %v147_v13 }
  0x1c   :  { %1955 = vmatpush3.msra.mxu0 %v147_v13 }
  0x1d   :  { %2212 = vset.pattern.permute.xlu0 %v2318_v5  ;;  %1956 = vmatprep.subr.mxu0 %v146_v17 }
  0x1e   :  { %1957 = vmatpush3.msra.mxu0 %v146_v17 }
  0x1f   :  { %1958 = vmatprep.subr.mxu0 %v145_v18 }
  0x20   :  { %1959 = vmatpush3.msra.mxu0 %v145_v18 }
  0x86   :  { %v90_v15 = vpop.permute.xlu1 %89  ;;  %v78_v16 = vpop.permute.xlu0 %77 }
  0x87   :  { %vm82_vm0 = vcmp.eq.s32.totalorder %v78_v16, %v63_v14  ;;  %vm94_vm3 = vcmp.eq.s32.totalorder %v90_v15, %v63_v14 }
  0x88   :  { %v1771_v21 = vsel %vm82_vm0, 1.0, %v2317_v4  ;;  %v1773_v27 = vsel %vm94_vm3, 1.0, %v2317_v4 }
  0x8a   :  { %v93_v19 = vpop.permute.xlu1 %92  ;;  %v81_v20 = vpop.permute.xlu0 %80 }
  0x8b   :  { %vm95_vm1 = vcmp.eq.s32.totalorder %v93_v19, %v63_v14  ;;  %vm83_vm2 = vcmp.eq.s32.totalorder %v81_v20, %v63_v14 }
  0x8c   :  { %v1772_v22 = vsel %vm83_vm2, 1.0, %v2317_v4  ;;  %v1774_v24 = vsel %vm95_vm1, 1.0, %v2317_v4 }
  0x8d   :  { %v2137_v23 = vpack.i.bf16 %v1772_v22, %v1771_v21  ;;  %v2142_v28 = vpack.i.bf16 %v1774_v24, %v1773_v27  ;;  %v2540_v27 = vld [vmem:[%s2886_s1 + $0x10] sm:$0xff] }
  0x8f   :  { %v105_v25 = vpop.permute.xlu1 %104  ;;  %2138 = vrot.lane.b32.xlu1 %v2137_v23, %s2320_s21  ;;  %v102_v26 = vpop.permute.xlu0 %101 }
  0x90   :  { %vm107_vm4 = vcmp.eq.s32.totalorder %v105_v25, %v63_v14  ;;  %vm106_vm5 = vcmp.eq.s32.totalorder %v102_v26, %v63_v14  ;;  %v2535_v26 = vld [vmem:[%s2886_s1] sm:$0xff] }
  0x91   :  { %v1776_v29 = vsel %vm107_vm4, 1.0, %v2317_v4  ;;  %v1775_v30 = vsel %vm106_vm5, 1.0, %v2317_v4 }
  0x92   :  { %v2147_v31 = vpack.i.bf16 %v1776_v29, %v1775_v30 }
  0x93   :  { %2143 = vrot.lane.b32.xlu1 %v2142_v28, %s2321_s20  ;;  %s2329_s20 = smov 8  }
  0x94   :  { %2148 = vrot.lane.b32.xlu0 %v2147_v31, %s2322_s22  ;;  %v66_v32 = vpop.permute.xlu1 %65  ;;  %v69_v33 = vpop.permute.xlu0 %68  ;;  %v2546_v31 = vld [vmem:[%s2886_s1 + $0x8] sm:$0xff]  ;;  %s2330_s22 = smov 24  }
  0x95   :  { %vm71_vm6 = vcmp.eq.s32.totalorder %v69_v33, %v63_v14  ;;  %vm70_vm7 = vcmp.eq.s32.totalorder %v66_v32, %v63_v14 }
  0x96   :  { %v1770_v37 = vsel %vm71_vm6, 1.0, %v2317_v4  ;;  %v1769_v39 = vsel %vm70_vm7, 1.0, %v2317_v4 }
 0x101   :  { %v2139_v34 = vpop.permute.xlu1 %2138 }
 0x102   :  { %v2141_v35 = vunpack.i.h.bf16 %v2139_v34  ;;  %v2140_v36 = vunpack.i.l.bf16 %v2139_v34  ;;  %v2553_v34 = vld [vmem:[%s2886_s1 + $0x18] sm:$0xff] }
 0x104   :  { %v138_v43 = vsel %vm136_vm8, %v1770_v37, %v2141_v35  ;;  %v137_v46 = vsel %vm136_vm8, %v1769_v39, %v2140_v36 }
 0x105   :  { %v2144_v38 = vpop.permute.xlu1 %2143 }
 0x106   :  { %v2146_v40 = vunpack.i.h.bf16 %v2144_v38  ;;  %v2145_v41 = vunpack.i.l.bf16 %v2144_v38  ;;  %v2149_v42 = vpop.permute.xlu0 %2148  ;;  %v2559_v38 = vld [vmem:[%s2886_s1 + $0x20] sm:$0xff] }
 0x107   :  { %v2151_v44 = vunpack.i.h.bf16 %v2149_v42  ;;  %v2150_v45 = vunpack.i.l.bf16 %v2149_v42  ;;  %v2567_v42 = vld [vmem:[%s2886_s1 + $0x30] sm:$0xff] }
 0x108   :  { %v140_v47 = vsel %vm139_vm9, %v137_v46, %v2145_v41  ;;  %v141_v48 = vsel %vm139_vm9, %v138_v43, %v2146_v40  ;;  %v2573_v46 = vld [vmem:[%s2886_s1 + $0x28] sm:$0xff] }
 0x109   :  { %v143_v49 = vsel %vm142_vm10, %v140_v47, %v2150_v45  ;;  %v144_v50 = vsel %vm142_vm10, %v141_v48, %v2151_v44 }
 0x10a   :  { %1960 = vmatprep.mubr.msk.f32.mxu0 %vm154_vm11, %v143_v49 }
 0x10b   :  { %1961 = vmatmul.mubr.msk.f32.vlgmr.msra.gmra.mxu0 %vm154_vm11, %v144_v50  ;;  %v2581_v50 = vld [vmem:[%s2886_s1 + $0x38] sm:$0xff] }
 0x1cb   :  { %v1962_v53 = vpop.f32.mrf.mxu0 }
 0x1cc   :  { %v2484_v56 = vadd.f32 %v1962_v53, %v153_v54 }
 0x1cd   :  { %v227_v55 = vpop.f32.mrf.mxu0 }
 0x1ce   :  { %v2486_v57 = vadd.f32 %v227_v55, %v153_v54 }
 0x1d0   :  { %v244_v58 = vpack.c.bf16 %v2484_v56, %v2486_v57 }
 0x1d2   :  { %1968 = vmatmul.mubr.msk.bf16.vlgmr.msra.gmra.mxu1 %vm139_vm9, %v244_v58 }
 0x292   :  { %v305_v59 = vpop.f32.mrf.mxu1 }
 0x293   :  { %v306_v63 = vadd.f32 %v1779_v60, %v305_v59 }
 0x294   :  { %v1969_v61 = vpop.f32.mrf.mxu1 }
 0x296   :  { %v308_v62 = vpop.f32.mrf.mxu1 }
 0x297   :  { %v309_v0 = vadd.f32 %v1779_v60, %v308_v62 }
 0x298   :  { %v1970_v1 = vpop.f32.mrf.mxu1 }
 0x299   :  { %v2157_v2 = vpack.i.bf16 %v309_v0, %v306_v63  ;;  %v2494_v3 = vpack.c.bf16 %v309_v0, %v306_v63 }
 0x29b   :  { %2158 = vrot.lane.b32.xlu0 %v2157_v2, %s2324_s3  ;;  %2153 = vrot.lane.b32.xlu1 %v2157_v2, %s2325_s0 }
 0x29c   :  { %1979 = vmatprep.mubr.msk.bf16.mxu1 %vm348_vm13, %v2494_v3 }
 0x29f   :  { %2163 = vrot.lane.b32.xlu1 %v2157_v2, %s2326_s19 }
 0x30d   :  { %v2159_v5 = vpop.permute.xlu0 %2158  ;;  %v2154_v6 = vpop.permute.xlu1 %2153 }
 0x30e   :  { %v2161_v7 = vunpack.i.h.bf16 %v2159_v5  ;;  %v2160_v8 = vunpack.i.l.bf16 %v2159_v5  ;;  %v2156_v9 = vunpack.i.h.bf16 %v2154_v6  ;;  %v2155_v10 = vunpack.i.l.bf16 %v2154_v6 }
 0x310   :  { %v2501_v11 = vpack.c.bf16 %v2161_v7, %v2160_v8  ;;  %v2503_v12 = vpack.c.bf16 %v2156_v9, %v2155_v10 }
 0x311   :  { %v2164_v13 = vpop.permute.xlu1 %2163 }
 0x312   :  { %v2166_v14 = vunpack.i.h.bf16 %v2164_v13  ;;  %v2165_v15 = vunpack.i.l.bf16 %v2164_v13  ;;  %344 = vrot.lane.b32.xlu1 %v2501_v11, %s2327_s2  ;;  %346 = vrot.lane.b32.xlu0 %v2503_v12, %s2327_s2 }
 0x314   :  { %v2509_v16 = vpack.c.bf16 %v2166_v14, %v2165_v15 }
 0x316   :  { %342 = vrot.lane.b32.xlu0 %v2509_v16, %s2327_s2  ;;  %340 = vrot.lane.b32.xlu1 %v2494_v3, %s2327_s2 }
 0x384   :  { %v347_v17 = vpop.permute.xlu0 %346  ;;  %v345_v19 = vpop.permute.xlu1 %344 }
 0x385   :  { %v371_v18 = vsel %vm348_vm13, %v347_v17, 0  ;;  %2107 = vmatprep.subr.msk.bf16.mxu1 %vm348_vm13, %v347_v17  ;;  %v368_v20 = vsel %vm348_vm13, %v345_v19, 0 }
 0x386   :  { %1972 = vmatpush3.bf16.xpose.msra.mxu1 %v371_v18 }
 0x387   :  { %2108 = vmatprep.subr.msk.bf16.mxu1 %vm348_vm13, %v345_v19 }
 0x388   :  { %v343_v21 = vpop.permute.xlu0 %342  ;;  %v341_v23 = vpop.permute.xlu1 %340 }
 0x389   :  { %v365_v22 = vsel %vm348_vm13, %v343_v21, 0  ;;  %v362_v24 = vsel %vm348_vm13, %v341_v23, 0 }
 0x38e   :  { %1974 = vmatpush3.bf16.xpose.msra.mxu1 %v368_v20 }
 0x38f   :  { %2109 = vmatprep.subr.msk.bf16.mxu1 %vm348_vm13, %v343_v21 }
 0x396   :  { %1976 = vmatpush3.bf16.xpose.msra.mxu1 %v365_v22 }
 0x397   :  { %2110 = vmatprep.subr.msk.bf16.mxu1 %vm348_vm13, %v341_v23 }
 0x39e   :  { %1978 = vmatpush3.bf16.xpose.msra.mxu1 %v362_v24 }
 0x39f   :  { %2019 = vmatprep.subr.bf16.mxu1 %v2317_v4 }
 0x3a5   :  { %1980 = vmatmul.mubr.msk.bf16.vlgmr.msra.gmra.mxu1 %vm348_vm13, %v2509_v16 }
 0x3a6   :  { %1983 = vmatprep.mubr.msk.bf16.mxu1 %vm348_vm13, %v2501_v11 }
 0x3ad   :  { %1984 = vmatmul.mubr.msk.bf16.gmra.mxu1 %vm348_vm13, %v2503_v12 }
 0x3ae   :  { %2027 = vmatprep.mubr.msk.bf16.mxu1 %vm2323_vm12, %v2317_v4 }
 0x465   :  { %v1981_v25 = vpop.f32.mrf.mxu1 }
 0x466   :  { %v416_v32 = vadd.f32 %v1981_v25, %v2540_v27 }
 0x467   :  { %v407_v28 = vpop.f32.mrf.mxu1 }
 0x468   :  { %v408_v29 = vadd.f32 %v407_v28, %v2535_v26  ;;  %v444_v41 = vsel %vm154_vm11, %v416_v32, -inf }
 0x469   :  { %v1982_v30 = vpop.f32.mrf.mxu1 }
 0x46a   :  { %v438_v33 = vsel %vm154_vm11, %v408_v29, -inf  ;;  %v419_v39 = vadd.f32 %v1982_v30, %v2553_v34 }
 0x46b   :  { %v410_v35 = vpop.f32.mrf.mxu1  ;;  %439 = vmax.xlane.f32.xlu0 %v438_v33 }
 0x46c   :  { %v411_v36 = vadd.f32 %v410_v35, %v2546_v31  ;;  %v447_v49 = vsel %vm154_vm11, %v419_v39, -inf }
 0x46d   :  { %v1985_v37 = vpop.f32.mrf.mxu1 }
 0x46e   :  { %v441_v40 = vsel %vm154_vm11, %v411_v36, -inf  ;;  %v432_v47 = vadd.f32 %v1985_v37, %v2567_v42 }
 0x46f   :  { %v423_v43 = vpop.f32.mrf.mxu1  ;;  %442 = vmax.xlane.f32.xlu1 %v441_v40  ;;  %445 = vmax.xlane.f32.xlu0 %v444_v41 }
 0x470   :  { %v424_v44 = vadd.f32 %v423_v43, %v2559_v38  ;;  %v456_v54 = vsel %vm154_vm11, %v432_v47, -inf }
 0x471   :  { %v1986_v45 = vpop.f32.mrf.mxu1 }
 0x472   :  { %v450_v48 = vsel %vm154_vm11, %v424_v44, -inf  ;;  %v435_v53 = vadd.f32 %v1986_v45, %v2581_v50 }
 0x473   :  { %v426_v51 = vpop.f32.mrf.mxu1  ;;  %451 = vmax.xlane.f32.xlu1 %v450_v48  ;;  %448 = vmax.xlane.f32.xlu0 %v447_v49 }
 0x474   :  { %v427_v52 = vadd.f32 %v426_v51, %v2573_v46  ;;  %v459_v58 = vsel %vm154_vm11, %v435_v53, -inf }
 0x476   :  { %v453_v55 = vsel %vm154_vm11, %v427_v52, -inf }
 0x477   :  { %457 = vmax.xlane.f32.xlu1 %v456_v54  ;;  %454 = vmax.xlane.f32.xlu0 %v453_v55 }
 0x47b   :  { %460 = vmax.xlane.f32.xlu0 %v459_v58 }
 0x488   :  { %536 = vrot.lane.b32.xlu1 %v2503_v12, %s2328_s27 }
 0x4f4   :  { %v440_v59 = vpop.xlane.xlu0 %439 }
 0x4f5   :  { %v462_v60 = vsub.f32 %v408_v29, %v440_v59 }
 0x4f7   :  { %v470_v1 = vmul.f32 1.442695, %v462_v60 }
 0x4f8   :  { %v443_v61 = vpop.xlane.xlu1 %442  ;;  %v446_v62 = vpop.xlane.xlu0 %445 }
 0x4f9   :  { %v464_v63 = vsub.f32 %v416_v32, %v446_v62  ;;  %v463_v2 = vsub.f32 %v411_v36, %v443_v61 }
 0x4fb   :  { %v474_v0 = vmul.f32 1.442695, %v464_v63  ;;  %v472_v9 = vmul.f32 1.442695, %v463_v2 }
 0x4fc   :  { %v452_v5 = vpop.xlane.xlu1 %451  ;;  %v449_v6 = vpop.xlane.xlu0 %448 }
 0x4fd   :  { %v465_v7 = vsub.f32 %v419_v39, %v449_v6  ;;  %2235 = vpow2.f32 %v474_v0  ;;  %v466_v10 = vsub.f32 %v424_v44, %v452_v5 }
 0x4fe   :  { %2237 = vpow2.f32 %v470_v1 }
 0x4ff   :  { %v476_v8 = vmul.f32 1.442695, %v465_v7  ;;  %v478_v17 = vmul.f32 1.442695, %v466_v10 }
 0x500   :  { %v458_v13 = vpop.xlane.xlu1 %457  ;;  %v455_v14 = vpop.xlane.xlu0 %454 }
 0x501   :  { %v468_v15 = vsub.f32 %v432_v47, %v458_v13  ;;  %2239 = vpow2.f32 %v476_v8  ;;  %v467_v18 = vsub.f32 %v427_v52, %v455_v14 }
 0x502   :  { %2241 = vpow2.f32 %v472_v9 }
 0x503   :  { %v482_v12 = vmul.f32 1.442695, %v468_v15  ;;  %v480_v23 = vmul.f32 1.442695, %v467_v18  ;;  %v2215_v18 = vld [vmem:[%s2887_s6 + $0x8] sm:$0xff]  }
 0x504   :  { %v537_v19 = vpop.permute.xlu1 %536  ;;  %v461_v20 = vpop.xlane.xlu0 %460 }
 0x505   :  { %2243 = vpow2.f32 %v482_v12  ;;  %v469_v21 = vsub.f32 %v435_v53, %v461_v20  ;;  %1987 = vmatprep.subr.bf16.mxu0 %v537_v19 }
 0x506   :  { %1988 = vmatpush3.bf16.msra.mxu0 %v537_v19  ;;  %2245 = vpow2.f32 %v478_v17 }
 0x507   :  { %v484_v22 = vmul.f32 1.442695, %v469_v21  ;;  %v2216_v21 = vld [vmem:[%s2887_s6] sm:$0xff]  }
 0x509   :  { %2247 = vpow2.f32 %v484_v22 }
 0x50a   :  { %v2236_v24 = vpop.eup %2235  ;;  %2249 = vpow2.f32 %v480_v23 }
 0x50b   :  { %v492_v25 = vsel %vm154_vm11, %v2236_v24, 0.0  ;;  %v2238_v28 = vpop.eup %2237 }
 0x50c   :  { %493 = vadd.xlane.f32.xlu1 %v492_v25  ;;  %v486_v30 = vsel %vm154_vm11, %v2238_v28, 0.0 }
 0x50e   :  { %v2240_v29 = vpop.eup %2239 }
 0x50f   :  { %v495_v32 = vsel %vm154_vm11, %v2240_v29, 0.0  ;;  %v2242_v33 = vpop.eup %2241 }
 0x510   :  { %487 = vadd.xlane.f32.xlu1 %v486_v30  ;;  %496 = vadd.xlane.f32.xlu0 %v495_v32  ;;  %v489_v37 = vsel %vm154_vm11, %v2242_v33, 0.0 }
 0x512   :  { %v2593_v35 = vpop.eup %2243 }
 0x513   :  { %v504_v36 = vsel %vm154_vm11, %v2593_v35, 0.0  ;;  %v2246_v39 = vpop.eup %2245 }
 0x514   :  { %505 = vadd.xlane.f32.xlu1 %v504_v36  ;;  %490 = vadd.xlane.f32.xlu0 %v489_v37  ;;  %v498_v43 = vsel %vm154_vm11, %v2246_v39, 0.0 }
 0x516   :  { %v2248_v40 = vpop.eup %2247 }
 0x517   :  { %v507_v41 = vsel %vm154_vm11, %v2248_v40, 0.0  ;;  %v2250_v44 = vpop.eup %2249 }
 0x518   :  { %499 = vadd.xlane.f32.xlu1 %v498_v43  ;;  %508 = vadd.xlane.f32.xlu0 %v507_v41  ;;  %v501_v45 = vsel %vm154_vm11, %v2250_v44, 0.0 }
 0x51c   :  { %502 = vadd.xlane.f32.xlu0 %v501_v45 }
 0x529   :  { %532 = vrot.lane.b32.xlu1 %v2509_v16, %s2328_s27 }
 0x52d   :  { %530 = vrot.lane.b32.xlu1 %v2494_v3, %s2328_s27 }
 0x532   :  { %534 = vrot.lane.b32.xlu0 %v2501_v11, %s2328_s27 }
 0x595   :  { %v494_v47 = vpop.xlane.xlu1 %493 }
 0x599   :  { %v488_v48 = vpop.xlane.xlu1 %487  ;;  %v497_v49 = vpop.xlane.xlu0 %496 }
 0x59a   :  { %2251 = vrcp.f32 %v488_v48 }
 0x59d   :  { %v506_v51 = vpop.xlane.xlu1 %505  ;;  %v491_v52 = vpop.xlane.xlu0 %490 }
 0x59e   :  { %2253 = vrcp.f32 %v491_v52 }
 0x59f   :  { %2255 = vrcp.f32 %v497_v49 }
 0x5a0   :  { %2257 = vrcp.f32 %v494_v47 }
 0x5a1   :  { %v500_v53 = vpop.xlane.xlu1 %499  ;;  %v509_v54 = vpop.xlane.xlu0 %508 }
 0x5a2   :  { %2259 = vrcp.f32 %v500_v53 }
 0x5a5   :  { %v503_v55 = vpop.xlane.xlu0 %502  ;;  %v533_v16 = vpop.permute.xlu1 %532 }
 0x5a6   :  { %2261 = vrcp.f32 %v503_v55  ;;  %v1791_v55 = vld [vmem:[%s2888_s7] ss:$0 sm:$0xff] }
 0x5a7   :  { %2263 = vrcp.f32 %v509_v54  ;;  %v2252_v58 = vpop.eup %2251 }
 0x5a8   :  { %2265 = vrcp.f32 %v506_v51  ;;  %v511_v60 = vmul.f32 %v2252_v58, %v2238_v28 }
 0x5a9   :  { %v535_v3 = vpop.permute.xlu0 %534  ;;  %v531_v63 = vpop.permute.xlu1 %530 }
 0x5aa   :  { %1989 = vmatprep.subr.bf16.mxu0 %v535_v3 }
 0x5ab   :  { %1990 = vmatpush3.bf16.msra.mxu0 %v535_v3  ;;  %v2254_v11 = vpop.eup %2253 }
 0x5ac   :  { %1991 = vmatprep.subr.bf16.mxu0 %v533_v16  ;;  %v2256_v59 = vpop.eup %2255  ;;  %v513_v61 = vmul.f32 %v2254_v11, %v2242_v33 }
 0x5ad   :  { %v2258_v62 = vpop.eup %2257  ;;  %v517_v1 = vmul.f32 %v2256_v59, %v2240_v29 }
 0x5ae   :  { %v526_v0 = vpack.c.bf16 %v513_v61, %v511_v60  ;;  %v515_v5 = vmul.f32 %v2258_v62, %v2236_v24 }
 0x5af   :  { %1992 = vmatpush3.bf16.msra.mxu0 %v533_v16  ;;  %v2260_v2 = vpop.eup %2259 }
 0x5b0   :  { %1993 = vmatprep.subr.bf16.mxu0 %v531_v63  ;;  %1995 = vmatprep.mubr.msk.bf16.mxu0 %vm154_vm11, %v526_v0  ;;  %v527_v7 = vpack.c.bf16 %v517_v1, %v515_v5  ;;  %v519_v8 = vmul.f32 %v2260_v2, %v2246_v39 }
 0x5b3   :  { %v2262_v6 = vpop.eup %2261  ;;  %1994 = vmatpush3.bf16.msra.mxu0 %v531_v63 }
 0x5b4   :  { %v521_v9 = vmul.f32 %v2262_v6, %v2250_v44  ;;  %2003 = vmatprep.subr.bf16.mxu0 %v2317_v4  ;;  %v2264_v10 = vpop.eup %2263 }
 0x5b5   :  { %v2266_v14 = vpop.eup %2265  ;;  %v525_v15 = vmul.f32 %v2264_v10, %v2248_v40 }
 0x5b6   :  { %1996 = vmatmul.mubr.msk.bf16.vlgmr.msra.gmra.mxu0 %vm154_vm11, %v527_v7  ;;  %v528_v13 = vpack.c.bf16 %v521_v9, %v519_v8  ;;  %v523_v12 = vmul.f32 %v2266_v14, %v2593_v35  ;;  %v2218_v14 = vld [vmem:[%s2889_s8] sm:$0xff]  }
 0x5b7   :  { %2004 = vmatpush3.bf16.msra.mxu0 %v2215_v18 }
 0x5b8   :  { %1999 = vmatprep.mubr.msk.bf16.mxu0 %vm154_vm11, %v528_v13  ;;  %v529_v17 = vpack.c.bf16 %v525_v15, %v523_v12  ;;  %2005 = vmatprep.subr.bf16.mxu0 %v2317_v4  ;;  %v2219_v15 = vld [vmem:[%s2890_s10 + $0x18] sm:$0xff]   ;;  %v2220_v12 = vld [vmem:[%s2890_s10 + $0x10] sm:$0xff]  }
 0x5b9   :  { %2020 = vmatpush3.bf16.msra.mxu1 %v2219_v15 }
 0x5ba   :  { %2021 = vmatprep.subr.bf16.mxu1 %v2317_v4 }
 0x5bb   :  { %2006 = vmatpush3.bf16.msra.mxu0 %v2216_v21 }
 0x5bc   :  { %2011 = vmatprep.subr.bf16.mxu0 %v2317_v4 }
 0x5bd   :  { %2022 = vmatpush3.bf16.msra.mxu1 %v2220_v12 }
 0x5be   :  { %2000 = vmatmul.mubr.msk.bf16.gmra.mxu0 %vm154_vm11, %v529_v17  ;;  %2023 = vmatprep.subr.bf16.mxu1 %v2317_v4 }
 0x5bf   :  { %2007 = vmatprep.mubr.msk.bf16.mxu0 %vm2323_vm12, %v2317_v4 }
 0x676   :  { %v1997_v19 = vpop.f32.mrf.mxu0 }
 0x678   :  { %v588_v20 = vpop.f32.mrf.mxu0 }
 0x67a   :  { %v1998_v22 = vpop.f32.mrf.mxu0 }
 0x67b   :  { %v2167_v23 = vpack.i.bf16 %v1998_v22, %v1997_v19 }
 0x67c   :  { %v591_v24 = vpop.f32.mrf.mxu0 }
 0x67d   :  { %2168 = vrot.lane.b32.xlu0 %v2167_v23, %s2329_s20 }
 0x67e   :  { %v2001_v25 = vpop.f32.mrf.mxu0 }
 0x680   :  { %v604_v28 = vpop.f32.mrf.mxu0 }
 0x682   :  { %v2002_v29 = vpop.f32.mrf.mxu0 }
 0x683   :  { %v2177_v30 = vpack.i.bf16 %v2002_v29, %v2001_v25  ;;  %v1795_v25 = vld [vmem:[%s2891_s12] ss:$0 sm:$0xff] }
 0x684   :  { %v607_v32 = vpop.f32.mrf.mxu0 }
 0x685   :  { %v2172_v33 = vpack.i.bf16 %v607_v32, %v604_v28  ;;  %2178 = vrot.lane.b32.xlu0 %v2177_v30, %s2330_s22  ;;  %v1796_v32 = vld [vmem:[%s2892_s13] ss:$0 sm:$0xff] }
 0x687   :  { %2173 = vrot.lane.b32.xlu1 %v2172_v33, %s2320_s21 }
 0x6ef   :  { %v2169_v35 = vpop.permute.xlu0 %2168 }
 0x6f0   :  { %v2171_v36 = vunpack.i.h.bf16 %v2169_v35  ;;  %v2170_v37 = vunpack.i.l.bf16 %v2169_v35 }
 0x6f2   :  { %v643_v44 = vsel %vm348_vm13, %v588_v20, %v2170_v37  ;;  %v644_v45 = vsel %vm348_vm13, %v591_v24, %v2171_v36 }
 0x6f7   :  { %v2179_v39 = vpop.permute.xlu0 %2178 }
 0x6f8   :  { %v2181_v47 = vunpack.i.h.bf16 %v2179_v39  ;;  %v2180_v48 = vunpack.i.l.bf16 %v2179_v39  ;;  %v2221_v39 = vld [vmem:[%s2890_s10 + $0x8] sm:$0xff]  }
 0x6f9   :  { %v2174_v40 = vpop.permute.xlu1 %2173  ;;  %2024 = vmatpush3.bf16.msra.mxu1 %v2221_v39 }
 0x6fa   :  { %v2176_v41 = vunpack.i.h.bf16 %v2174_v40  ;;  %v2175_v43 = vunpack.i.l.bf16 %v2174_v40  ;;  %2025 = vmatprep.subr.bf16.mxu1 %v2317_v4  ;;  %v2222_v40 = vld [vmem:[%s2890_s10] sm:$0xff]  }
 0x6fc   :  { %v646_v49 = vsel %vm136_vm8, %v644_v45, %v2176_v41  ;;  %v645_v51 = vsel %vm136_vm8, %v643_v44, %v2175_v43  ;;  %v1797_v41 = vld [vmem:[%s2893_s9] ss:$0 sm:$0xff] }
 0x6fd   :  { %v649_v52 = vsel %vm647_vm14, %v646_v49, %v2181_v47  ;;  %v648_v53 = vsel %vm647_vm14, %v645_v51, %v2180_v48  ;;  %2026 = vmatpush3.bf16.msra.mxu1 %v2222_v40 }
 0x6fe   :  { %v650_v54 = vpack.c.bf16 %v649_v52, %v648_v53 }
 0x700   :  { %2008 = vmatmul.mubr.msk.bf16.vlgmr.msra.gmra.mxu0 %vm139_vm9, %v650_v54  ;;  %v1801_v54 = vld [vmem:[%s2894_s11] ss:$0 sm:$0xff] }
 0x701   :  { %2015 = vmatprep.mubr.msk.bf16.mxu0 %vm2323_vm12, %v2317_v4 }
 0x7c0   :  { %v711_v16 = vpop.f32.mrf.mxu0 }
 0x7c1   :  { %v712_v3 = vadd.f32 %v1791_v55, %v711_v16 }
 0x7c2   :  { %v2009_v58 = vpop.f32.mrf.mxu0 }
 0x7c3   :  { %v718_v11 = vadd.f32 %v712_v3, %v2486_v57 }
 0x7c4   :  { %v714_v59 = vpop.f32.mrf.mxu0 }
 0x7c5   :  { %v715_v60 = vadd.f32 %v1791_v55, %v714_v59  ;;  %v722_v61 = vsel %vm139_vm9, %v718_v11, 0.0 }
 0x7c6   :  { %723 = vadd.xlane.f32.xlu1 %v722_v61  ;;  %v2010_v62 = vpop.f32.mrf.mxu0 }
 0x7c7   :  { %v719_v63 = vadd.f32 %v715_v60, %v2484_v56  ;;  %v2217_v56 = vld [vmem:[%s2889_s8 + $0x8] sm:$0xff]  }
 0x7c8   :  { %2012 = vmatpush3.bf16.msra.mxu0 %v2217_v56  ;;  %v2224_v56 = vld [vmem:[%s2908_s24 + $0x10] sm:$0xff]  }
 0x7c9   :  { %v725_v0 = vsel %vm139_vm9, %v719_v63, 0.0  ;;  %2013 = vmatprep.subr.bf16.mxu0 %v2317_v4 }
 0x7ca   :  { %726 = vadd.xlane.f32.xlu0 %v725_v0 }
 0x7cc   :  { %2014 = vmatpush3.bf16.msra.mxu0 %v2218_v14 }
 0x7cd   :  { %2031 = vmatprep.subr.bf16.mxu0 %v2317_v4 }
 0x84f   :  { %v724_v1 = vpop.xlane.xlu1 %723 }
 0x850   :  { %v729_v2 = vmul.f32 0.03125, %v724_v1 }
 0x852   :  { %v731_v5 = vsub.f32 %v718_v11, %v729_v2 }
 0x853   :  { %v727_v6 = vpop.xlane.xlu0 %726 }
 0x854   :  { %v730_v7 = vmul.f32 0.03125, %v727_v6  ;;  %v733_v8 = vmul.f32 %v731_v5, %v731_v5 }
 0x856   :  { %v732_v9 = vsub.f32 %v719_v63, %v730_v7  ;;  %v735_v57 = vsel %vm139_vm9, %v733_v8, 0.0 }
 0x857   :  { %736 = vadd.xlane.f32.xlu0 %v735_v57 }
 0x858   :  { %v734_v10 = vmul.f32 %v732_v9, %v732_v9 }
 0x85a   :  { %v738_v13 = vsel %vm139_vm9, %v734_v10, 0.0 }
 0x85b   :  { %739 = vadd.xlane.f32.xlu1 %v738_v13  ;;  %v2223_v13 = vld [vmem:[%s2908_s24 + $0x18] sm:$0xff]  }
 0x8e0   :  { %v737_v17 = vpop.xlane.xlu0 %736 }
 0x8e1   :  { %v741_v18 = vmul.f32 0.03125, %v737_v17 }
 0x8e3   :  { %v743_v19 = vadd.f32 1e-05, %v741_v18 }
 0x8e4   :  { %v740_v20 = vpop.xlane.xlu1 %739 }
 0x8e5   :  { %2267 = vrsqrt.f32 %v743_v19  ;;  %v742_v21 = vmul.f32 0.03125, %v740_v20 }
 0x8e7   :  { %v744_v22 = vadd.f32 1e-05, %v742_v21 }
 0x8e9   :  { %2269 = vrsqrt.f32 %v744_v22  ;;  %v1807_v22 = vld [vmem:[%s2895_s14] ss:$0 sm:$0xff] }
 0x8f2   :  { %v2268_v23 = vpop.eup %2267 }
 0x8f3   :  { %v747_v24 = vmul.f32 %v2268_v23, %v731_v5 }
 0x8f5   :  { %v755_v30 = vmul.f32 %v1795_v25, %v747_v24 }
 0x8f6   :  { %v2270_v28 = vpop.eup %2269 }
 0x8f7   :  { %v748_v29 = vmul.f32 %v2270_v28, %v732_v9  ;;  %v763_v35 = vadd.f32 %v1796_v32, %v755_v30  ;;  %v1808_v28 = vld [vmem:[%s2896_s15] ss:$0 sm:$0xff] }
 0x8f9   :  { %v756_v33 = vmul.f32 %v1795_v25, %v748_v29 }
 0x8fb   :  { %v764_v36 = vadd.f32 %v1796_v32, %v756_v33 }
 0x8fd   :  { %v765_v37 = vpack.c.bf16 %v764_v36, %v763_v35 }
 0x8ff   :  { %2016 = vmatmul.mubr.msk.bf16.vlgmr.msra.gmra.mxu0 %vm139_vm9, %v765_v37 }
 0x900   :  { %2035 = vmatprep.mubr.msk.bf16.mxu0 %vm2323_vm12, %v2317_v4  ;;  %2032 = vmatpush3.bf16.msra.mxu0 %v2223_v13 }
 0x901   :  { %2033 = vmatprep.subr.bf16.mxu0 %v2317_v4 }
 0x904   :  { %2034 = vmatpush3.bf16.msra.mxu0 %v2224_v56 }
 0x9bf   :  { %v826_v43 = vpop.f32.mrf.mxu0 }
 0x9c0   :  { %v827_v45 = vadd.f32 %v1797_v41, %v826_v43 }
 0x9c1   :  { %v2017_v44 = vpop.f32.mrf.mxu0 }
 0x9c2   :  { %v833_v51 = vmax.f32 %v827_v45, 0.0 }
 0x9c3   :  { %v829_v47 = vpop.f32.mrf.mxu0 }
 0x9c4   :  { %v830_v48 = vadd.f32 %v1797_v41, %v829_v47 }
 0x9c5   :  { %v2018_v49 = vpop.f32.mrf.mxu0 }
 0x9c6   :  { %v834_v52 = vmax.f32 %v830_v48, 0.0 }
 0x9c8   :  { %v835_v53 = vpack.c.bf16 %v834_v52, %v833_v51 }
 0x9ca   :  { %2028 = vmatmul.mubr.msk.bf16.vlgmr.msra.gmra.mxu1 %vm154_vm11, %v835_v53 }
 0xa8a   :  { %v912_v55 = vpop.f32.mrf.mxu1 }
 0xa8b   :  { %v913_v16 = vadd.f32 %v1801_v54, %v912_v55 }
 0xa8c   :  { %v2029_v3 = vpop.f32.mrf.mxu1 }
 0xa8d   :  { %v919_v58 = vadd.f32 %v913_v16, %v763_v35 }
 0xa8e   :  { %v915_v11 = vpop.f32.mrf.mxu1 }
 0xa8f   :  { %v916_v59 = vadd.f32 %v1801_v54, %v915_v11  ;;  %v923_v60 = vsel %vm139_vm9, %v919_v58, 0.0 }
 0xa90   :  { %924 = vadd.xlane.f32.xlu0 %v923_v60  ;;  %v2030_v61 = vpop.f32.mrf.mxu1 }
 0xa91   :  { %v920_v62 = vadd.f32 %v916_v59, %v764_v36  ;;  %v1814_v36 = vld [vmem:[%s2885_s5 + $0x1] ss:$0 sm:$0xff] }
 0xa93   :  { %v926_v63 = vsel %vm139_vm9, %v920_v62, 0.0 }
 0xa94   :  { %927 = vadd.xlane.f32.xlu1 %v926_v63 }
 0xb19   :  { %v925_v0 = vpop.xlane.xlu0 %924 }
 0xb1a   :  { %v929_v1 = vmul.f32 0.03125, %v925_v0 }
 0xb1c   :  { %v931_v2 = vsub.f32 %v919_v58, %v929_v1 }
 0xb1d   :  { %v928_v5 = vpop.xlane.xlu1 %927 }
 0xb1e   :  { %v930_v6 = vmul.f32 0.03125, %v928_v5  ;;  %v933_v7 = vmul.f32 %v931_v2, %v931_v2 }
 0xb20   :  { %v932_v8 = vsub.f32 %v920_v62, %v930_v6  ;;  %v935_v9 = vsel %vm139_vm9, %v933_v7, 0.0 }
 0xb21   :  { %936 = vadd.xlane.f32.xlu0 %v935_v9 }
 0xb22   :  { %v934_v57 = vmul.f32 %v932_v8, %v932_v8 }
 0xb24   :  { %v938_v10 = vsel %vm139_vm9, %v934_v57, 0.0 }
 0xb25   :  { %939 = vadd.xlane.f32.xlu1 %v938_v10 }
 0xbaa   :  { %v937_v14 = vpop.xlane.xlu0 %936 }
 0xbab   :  { %v941_v15 = vmul.f32 0.03125, %v937_v14 }
 0xbad   :  { %v943_v12 = vadd.f32 1e-05, %v941_v15 }
 0xbae   :  { %v940_v17 = vpop.xlane.xlu1 %939 }
 0xbaf   :  { %2271 = vrsqrt.f32 %v943_v12  ;;  %v942_v18 = vmul.f32 0.03125, %v940_v17 }
 0xbb1   :  { %v944_v19 = vadd.f32 1e-05, %v942_v18 }
 0xbb3   :  { %2273 = vrsqrt.f32 %v944_v19 }
 0xbbc   :  { %v2272_v20 = vpop.eup %2271 }
 0xbbd   :  { %v947_v21 = vmul.f32 %v2272_v20, %v931_v2 }
 0xbbf   :  { %v955_v25 = vmul.f32 %v1807_v22, %v947_v21 }
 0xbc0   :  { %v2274_v23 = vpop.eup %2273 }
 0xbc1   :  { %v948_v24 = vmul.f32 %v2274_v23, %v932_v8  ;;  %v2700_v30 = vadd.f32 %v1808_v28, %v955_v25 }
 0xbc3   :  { %v956_v29 = vmul.f32 %v1807_v22, %v948_v24 }
 0xbc5   :  { %v2702_v32 = vadd.f32 %v1808_v28, %v956_v29 }
 0xbc7   :  { %v965_v33 = vpack.c.bf16 %v2702_v32, %v2700_v30 }
 0xbc9   :  { %2036 = vmatmul.mubr.msk.bf16.vlgmr.msra.gmra.mxu0 %vm139_vm9, %v965_v33 }
 0xc89   :  { %v1028_v35 = vpop.f32.mrf.mxu0 }
 0xc8a   :  { %v1029_v40 = vadd.f32 %v1814_v36, %v1028_v35 }
 0xc8b   :  { %v2037_v37 = vpop.f32.mrf.mxu0 }
 0xc8d   :  { %v1031_v39 = vpop.f32.mrf.mxu0 }
 0xc8e   :  { %v1032_v41 = vadd.f32 %v1814_v36, %v1031_v39 }
 0xc8f   :  { %v2038_v43 = vpop.f32.mrf.mxu0 }
 0xc90   :  { %v2187_v44 = vpack.i.bf16 %v1032_v41, %v1029_v40  ;;  %v2710_v45 = vpack.c.bf16 %v1032_v41, %v1029_v40 }
 0xc92   :  { %2188 = vrot.lane.b32.xlu1 %v2187_v44, %s2324_s3  ;;  %2183 = vrot.lane.b32.xlu0 %v2187_v44, %s2325_s0 }
 0xc93   :  { %2047 = vmatprep.mubr.msk.bf16.mxu1 %vm348_vm13, %v2710_v45 }
 0xc96   :  { %2193 = vrot.lane.b32.xlu1 %v2187_v44, %s2326_s19 }
 0xd04   :  { %v2189_v47 = vpop.permute.xlu1 %2188  ;;  %v2184_v48 = vpop.permute.xlu0 %2183 }
 0xd05   :  { %v2191_v49 = vunpack.i.h.bf16 %v2189_v47  ;;  %v2190_v51 = vunpack.i.l.bf16 %v2189_v47  ;;  %v2186_v52 = vunpack.i.h.bf16 %v2184_v48  ;;  %v2185_v53 = vunpack.i.l.bf16 %v2184_v48 }
 0xd07   :  { %v2717_v54 = vpack.c.bf16 %v2191_v49, %v2190_v51  ;;  %v1058_v55 = vpack.c.bf16 %v2186_v52, %v2185_v53 }
 0xd08   :  { %v2194_v16 = vpop.permute.xlu1 %2193 }
 0xd09   :  { %v2196_v3 = vunpack.i.h.bf16 %v2194_v16  ;;  %v2195_v58 = vunpack.i.l.bf16 %v2194_v16  ;;  %1067 = vrot.lane.b32.xlu1 %v2717_v54, %s2327_s2  ;;  %1069 = vrot.lane.b32.xlu0 %v1058_v55, %s2327_s2 }
 0xd0b   :  { %v2722_v11 = vpack.c.bf16 %v2196_v3, %v2195_v58 }
 0xd0d   :  { %1065 = vrot.lane.b32.xlu0 %v2722_v11, %s2327_s2  ;;  %1063 = vrot.lane.b32.xlu1 %v2710_v45, %s2327_s2 }
 0xd7b   :  { %v1070_v59 = vpop.permute.xlu0 %1069  ;;  %v1068_v61 = vpop.permute.xlu1 %1067 }
 0xd7c   :  { %v1093_v60 = vsel %vm348_vm13, %v1070_v59, 0  ;;  %2111 = vmatprep.subr.msk.bf16.mxu1 %vm348_vm13, %v1070_v59  ;;  %v1090_v62 = vsel %vm348_vm13, %v1068_v61, 0 }
 0xd7d   :  { %2040 = vmatpush3.bf16.xpose.msra.mxu1 %v1093_v60 }
 0xd7e   :  { %2112 = vmatprep.subr.msk.bf16.mxu1 %vm348_vm13, %v1068_v61 }
 0xd7f   :  { %v1066_v63 = vpop.permute.xlu0 %1065  ;;  %v1064_v1 = vpop.permute.xlu1 %1063 }
 0xd80   :  { %v1087_v0 = vsel %vm348_vm13, %v1066_v63, 0  ;;  %v1084_v2 = vsel %vm348_vm13, %v1064_v1, 0 }
 0xd85   :  { %2042 = vmatpush3.bf16.xpose.msra.mxu1 %v1090_v62 }
 0xd86   :  { %2113 = vmatprep.subr.msk.bf16.mxu1 %vm348_vm13, %v1066_v63 }
 0xd8d   :  { %2044 = vmatpush3.bf16.xpose.msra.mxu1 %v1087_v0 }
 0xd8e   :  { %2114 = vmatprep.subr.msk.bf16.mxu1 %vm348_vm13, %v1064_v1 }
 0xd95   :  { %2046 = vmatpush3.bf16.xpose.msra.mxu1 %v1084_v2 }
 0xd96   :  { %2087 = vmatprep.subr.bf16.mxu1 %v2317_v4 }
 0xd9c   :  { %2048 = vmatmul.mubr.msk.bf16.vlgmr.msra.gmra.mxu1 %vm348_vm13, %v2722_v11 }
 0xd9d   :  { %2051 = vmatprep.mubr.msk.bf16.mxu1 %vm348_vm13, %v2717_v54 }
 0xda4   :  { %2052 = vmatmul.mubr.msk.bf16.gmra.mxu1 %vm348_vm13, %v1058_v55 }
 0xda5   :  { %2095 = vmatprep.mubr.msk.bf16.mxu1 %vm2323_vm12, %v2317_v4 }
 0xe5c   :  { %v2049_v5 = vpop.f32.mrf.mxu1 }
 0xe5d   :  { %v1138_v9 = vadd.f32 %v2049_v5, %v2540_v27 }
 0xe5e   :  { %v1129_v6 = vpop.f32.mrf.mxu1 }
 0xe5f   :  { %v1130_v7 = vadd.f32 %v1129_v6, %v2535_v26  ;;  %v1166_v12 = vsel %vm154_vm11, %v1138_v9, -inf }
 0xe60   :  { %v2050_v8 = vpop.f32.mrf.mxu1 }
 0xe61   :  { %v1160_v57 = vsel %vm154_vm11, %v1130_v7, -inf  ;;  %v1141_v14 = vadd.f32 %v2050_v8, %v2553_v34 }
 0xe62   :  { %v1132_v10 = vpop.f32.mrf.mxu1  ;;  %1161 = vmax.xlane.f32.xlu0 %v1160_v57 }
 0xe63   :  { %v1133_v13 = vadd.f32 %v1132_v10, %v2546_v31  ;;  %v1169_v20 = vsel %vm154_vm11, %v1141_v14, -inf }
 0xe64   :  { %v2053_v56 = vpop.f32.mrf.mxu1 }
 0xe65   :  { %v1163_v15 = vsel %vm154_vm11, %v1133_v13, -inf  ;;  %v1154_v27 = vadd.f32 %v2053_v56, %v2567_v42 }
 0xe66   :  { %v1145_v17 = vpop.f32.mrf.mxu1  ;;  %1164 = vmax.xlane.f32.xlu1 %v1163_v15  ;;  %1167 = vmax.xlane.f32.xlu0 %v1166_v12 }
 0xe67   :  { %v1146_v26 = vadd.f32 %v1145_v17, %v2559_v38  ;;  %v1178_v22 = vsel %vm154_vm11, %v1154_v27, -inf }
 0xe68   :  { %v2054_v18 = vpop.f32.mrf.mxu1 }
 0xe69   :  { %v1172_v19 = vsel %vm154_vm11, %v1146_v26, -inf  ;;  %v1157_v21 = vadd.f32 %v2054_v18, %v2581_v50 }
 0xe6a   :  { %v1148_v31 = vpop.f32.mrf.mxu1  ;;  %1173 = vmax.xlane.f32.xlu1 %v1172_v19  ;;  %1170 = vmax.xlane.f32.xlu0 %v1169_v20 }
 0xe6b   :  { %v1149_v34 = vadd.f32 %v1148_v31, %v2573_v46  ;;  %v1181_v38 = vsel %vm154_vm11, %v1157_v21, -inf }
 0xe6d   :  { %v1175_v23 = vsel %vm154_vm11, %v1149_v34, -inf }
 0xe6e   :  { %1179 = vmax.xlane.f32.xlu1 %v1178_v22  ;;  %1176 = vmax.xlane.f32.xlu0 %v1175_v23 }
 0xe72   :  { %1182 = vmax.xlane.f32.xlu0 %v1181_v38 }
 0xe7f   :  { %1258 = vrot.lane.b32.xlu1 %v1058_v55, %s2328_s27 }
 0xeeb   :  { %v1162_v42 = vpop.xlane.xlu0 %1161 }
 0xeec   :  { %v1184_v24 = vsub.f32 %v1130_v7, %v1162_v42 }
 0xeee   :  { %v1192_v46 = vmul.f32 1.442695, %v1184_v24 }
 0xeef   :  { %v1165_v25 = vpop.xlane.xlu1 %1164  ;;  %v1168_v28 = vpop.xlane.xlu0 %1167 }
 0xef0   :  { %v1186_v29 = vsub.f32 %v1138_v9, %v1168_v28  ;;  %v1185_v35 = vsub.f32 %v1133_v13, %v1165_v25 }
 0xef2   :  { %v1196_v33 = vmul.f32 1.442695, %v1186_v29  ;;  %v1194_v40 = vmul.f32 1.442695, %v1185_v35 }
 0xef3   :  { %v1174_v50 = vpop.xlane.xlu1 %1173  ;;  %v1171_v36 = vpop.xlane.xlu0 %1170 }
 0xef4   :  { %v1187_v37 = vsub.f32 %v1141_v14, %v1171_v36  ;;  %2275 = vpow2.f32 %v1196_v33  ;;  %v1188_v41 = vsub.f32 %v1146_v26, %v1174_v50 }
 0xef5   :  { %2277 = vpow2.f32 %v1192_v46 }
 0xef6   :  { %v1198_v39 = vmul.f32 1.442695, %v1187_v37  ;;  %v1200_v49 = vmul.f32 1.442695, %v1188_v41 }
 0xef7   :  { %v1180_v43 = vpop.xlane.xlu1 %1179  ;;  %v1177_v44 = vpop.xlane.xlu0 %1176 }
 0xef8   :  { %v1190_v47 = vsub.f32 %v1154_v27, %v1180_v43  ;;  %2279 = vpow2.f32 %v1198_v39  ;;  %v1189_v51 = vsub.f32 %v1149_v34, %v1177_v44  ;;  %v2225_v39 = vld [vmem:[%s2887_s6 + $0x18] sm:$0xff]   ;;  %v2226_v43 = vld [vmem:[%s2887_s6 + $0x10] sm:$0xff]  }
 0xef9   :  { %2281 = vpow2.f32 %v1194_v40 }
 0xefa   :  { %v1204_v48 = vmul.f32 1.442695, %v1190_v47  ;;  %v1202_v3 = vmul.f32 1.442695, %v1189_v51 }
 0xefb   :  { %v1259_v52 = vpop.permute.xlu1 %1258  ;;  %v1183_v53 = vpop.xlane.xlu0 %1182 }
 0xefc   :  { %2283 = vpow2.f32 %v1204_v48  ;;  %v1191_v55 = vsub.f32 %v1157_v21, %v1183_v53  ;;  %2055 = vmatprep.subr.bf16.mxu0 %v1259_v52 }
 0xefd   :  { %2056 = vmatpush3.bf16.msra.mxu0 %v1259_v52  ;;  %2285 = vpow2.f32 %v1200_v49 }
 0xefe   :  { %v1206_v16 = vmul.f32 1.442695, %v1191_v55 }
 0xf00   :  { %2287 = vpow2.f32 %v1206_v16 }
 0xf01   :  { %v2276_v58 = vpop.eup %2275  ;;  %2289 = vpow2.f32 %v1202_v3 }
 0xf02   :  { %v1214_v59 = vsel %vm154_vm11, %v2276_v58, 0.0  ;;  %v2278_v60 = vpop.eup %2277 }
 0xf03   :  { %1215 = vadd.xlane.f32.xlu1 %v1214_v59  ;;  %v1208_v62 = vsel %vm154_vm11, %v2278_v60, 0.0 }
 0xf05   :  { %v2280_v61 = vpop.eup %2279 }
 0xf06   :  { %v1217_v63 = vsel %vm154_vm11, %v2280_v61, 0.0  ;;  %v2282_v0 = vpop.eup %2281 }
 0xf07   :  { %1209 = vadd.xlane.f32.xlu1 %v1208_v62  ;;  %1218 = vadd.xlane.f32.xlu0 %v1217_v63  ;;  %v1211_v5 = vsel %vm154_vm11, %v2282_v0, 0.0 }
 0xf09   :  { %v2764_v1 = vpop.eup %2283 }
 0xf0a   :  { %v1226_v2 = vsel %vm154_vm11, %v2764_v1, 0.0  ;;  %v2286_v6 = vpop.eup %2285 }
 0xf0b   :  { %1227 = vadd.xlane.f32.xlu1 %v1226_v2  ;;  %1212 = vadd.xlane.f32.xlu0 %v1211_v5  ;;  %v1220_v9 = vsel %vm154_vm11, %v2286_v6, 0.0 }
 0xf0d   :  { %v2288_v7 = vpop.eup %2287 }
 0xf0e   :  { %v1229_v8 = vsel %vm154_vm11, %v2288_v7, 0.0  ;;  %v2290_v57 = vpop.eup %2289 }
 0xf0f   :  { %1221 = vadd.xlane.f32.xlu1 %v1220_v9  ;;  %1230 = vadd.xlane.f32.xlu0 %v1229_v8  ;;  %v1223_v10 = vsel %vm154_vm11, %v2290_v57, 0.0 }
 0xf13   :  { %1224 = vadd.xlane.f32.xlu0 %v1223_v10  ;;  %v1831_v10 = vld [vmem:[%s2888_s7 + $0x1] ss:$0 sm:$0xff] }
 0xf20   :  { %1254 = vrot.lane.b32.xlu1 %v2722_v11, %s2328_s27 }
 0xf24   :  { %1252 = vrot.lane.b32.xlu1 %v2710_v45, %s2328_s27 }
 0xf29   :  { %1256 = vrot.lane.b32.xlu0 %v2717_v54, %s2328_s27 }
 0xf8c   :  { %v1216_v13 = vpop.xlane.xlu1 %1215 }
 0xf90   :  { %v1210_v56 = vpop.xlane.xlu1 %1209  ;;  %v1219_v14 = vpop.xlane.xlu0 %1218 }
 0xf91   :  { %2291 = vrcp.f32 %v1210_v56 }
 0xf94   :  { %v1228_v15 = vpop.xlane.xlu1 %1227  ;;  %v1213_v12 = vpop.xlane.xlu0 %1212 }
 0xf95   :  { %2293 = vrcp.f32 %v1213_v12 }
 0xf96   :  { %2295 = vrcp.f32 %v1219_v14 }
 0xf97   :  { %2297 = vrcp.f32 %v1216_v13 }
 0xf98   :  { %v1222_v17 = vpop.xlane.xlu1 %1221  ;;  %v1231_v26 = vpop.xlane.xlu0 %1230 }
 0xf99   :  { %2299 = vrcp.f32 %v1222_v17 }
 0xf9c   :  { %v1225_v18 = vpop.xlane.xlu0 %1224  ;;  %v1255_v11 = vpop.permute.xlu1 %1254 }
 0xf9d   :  { %2301 = vrcp.f32 %v1225_v18 }
 0xf9e   :  { %2303 = vrcp.f32 %v1231_v26  ;;  %v2292_v27 = vpop.eup %2291 }
 0xf9f   :  { %2305 = vrcp.f32 %v1228_v15  ;;  %v1233_v20 = vmul.f32 %v2292_v27, %v2278_v60 }
 0xfa0   :  { %v1257_v45 = vpop.permute.xlu0 %1256  ;;  %v1253_v21 = vpop.permute.xlu1 %1252 }
 0xfa1   :  { %2057 = vmatprep.subr.bf16.mxu0 %v1257_v45 }
 0xfa2   :  { %2058 = vmatpush3.bf16.msra.mxu0 %v1257_v45  ;;  %v2294_v54 = vpop.eup %2293 }
 0xfa3   :  { %2059 = vmatprep.subr.bf16.mxu0 %v1255_v11  ;;  %v2296_v19 = vpop.eup %2295  ;;  %v1235_v31 = vmul.f32 %v2294_v54, %v2282_v0 }
 0xfa4   :  { %v2298_v34 = vpop.eup %2297  ;;  %v1239_v23 = vmul.f32 %v2296_v19, %v2280_v61 }
 0xfa5   :  { %v1248_v22 = vpack.c.bf16 %v1235_v31, %v1233_v20  ;;  %v1237_v42 = vmul.f32 %v2298_v34, %v2276_v58 }
 0xfa6   :  { %2060 = vmatpush3.bf16.msra.mxu0 %v1255_v11  ;;  %v2300_v38 = vpop.eup %2299 }
 0xfa7   :  { %2061 = vmatprep.subr.bf16.mxu0 %v1253_v21  ;;  %2063 = vmatprep.mubr.msk.bf16.mxu0 %vm154_vm11, %v1248_v22  ;;  %v1249_v25 = vpack.c.bf16 %v1239_v23, %v1237_v42  ;;  %v1241_v28 = vmul.f32 %v2300_v38, %v2286_v6  ;;  %v2228_v38 = vld [vmem:[%s2889_s8 + $0x10] sm:$0xff]   ;;  %v2229_v42 = vld [vmem:[%s2890_s10 + $0x38] sm:$0xff]  }
 0xfa8   :  { %2088 = vmatpush3.bf16.msra.mxu1 %v2229_v42 }
 0xfa9   :  { %2089 = vmatprep.subr.bf16.mxu1 %v2317_v4 }
 0xfaa   :  { %v2302_v24 = vpop.eup %2301  ;;  %2062 = vmatpush3.bf16.msra.mxu0 %v1253_v21 }
 0xfab   :  { %v1243_v29 = vmul.f32 %v2302_v24, %v2290_v57  ;;  %2071 = vmatprep.subr.bf16.mxu0 %v2317_v4  ;;  %v2304_v33 = vpop.eup %2303  ;;  %v2230_v24 = vld [vmem:[%s2890_s10 + $0x30] sm:$0xff]  }
 0xfac   :  { %v2306_v35 = vpop.eup %2305  ;;  %v1247_v50 = vmul.f32 %v2304_v33, %v2288_v7  ;;  %2090 = vmatpush3.bf16.msra.mxu1 %v2230_v24 }
 0xfad   :  { %2064 = vmatmul.mubr.msk.bf16.vlgmr.msra.gmra.mxu0 %vm154_vm11, %v1249_v25  ;;  %v1250_v46 = vpack.c.bf16 %v1243_v29, %v1241_v28  ;;  %v1245_v36 = vmul.f32 %v2306_v35, %v2764_v1  ;;  %2091 = vmatprep.subr.bf16.mxu1 %v2317_v4 }
 0xfae   :  { %2072 = vmatpush3.bf16.msra.mxu0 %v2225_v39 }
 0xfaf   :  { %2067 = vmatprep.mubr.msk.bf16.mxu0 %vm154_vm11, %v1250_v46  ;;  %v1251_v37 = vpack.c.bf16 %v1247_v50, %v1245_v36  ;;  %2073 = vmatprep.subr.bf16.mxu0 %v2317_v4 }
 0xfb2   :  { %2074 = vmatpush3.bf16.msra.mxu0 %v2226_v43  ;;  %v1838_v43 = vld [vmem:[%s2892_s13 + $0x1] ss:$0 sm:$0xff] }
 0xfb3   :  { %2079 = vmatprep.subr.bf16.mxu0 %v2317_v4 }
 0xfb5   :  { %2068 = vmatmul.mubr.msk.bf16.gmra.mxu0 %vm154_vm11, %v1251_v37  ;;  %v1837_v37 = vld [vmem:[%s2891_s12 + $0x1] ss:$0 sm:$0xff] }
 0xfb6   :  { %2075 = vmatprep.mubr.msk.bf16.mxu0 %vm2323_vm12, %v2317_v4 }
0x106d   :  { %v2065_v40 = vpop.f32.mrf.mxu0 }
0x106f   :  { %v1310_v41 = vpop.f32.mrf.mxu0 }
0x1071   :  { %v2066_v44 = vpop.f32.mrf.mxu0 }
0x1072   :  { %v2197_v47 = vpack.i.bf16 %v2066_v44, %v2065_v40 }
0x1073   :  { %v1313_v48 = vpop.f32.mrf.mxu0 }
0x1074   :  { %2198 = vrot.lane.b32.xlu0 %v2197_v47, %s2329_s20 }
0x1075   :  { %v2069_v49 = vpop.f32.mrf.mxu0 }
0x1077   :  { %v1326_v51 = vpop.f32.mrf.mxu0 }
0x1079   :  { %v2070_v52 = vpop.f32.mrf.mxu0 }
0x107a   :  { %v2207_v53 = vpack.i.bf16 %v2070_v52, %v2069_v49  ;;  %v2232_v52 = vld [vmem:[%s2890_s10 + $0x20] sm:$0xff]  }
0x107b   :  { %v1329_v55 = vpop.f32.mrf.mxu0 }
0x107c   :  { %v2202_v16 = vpack.i.bf16 %v1329_v55, %v1326_v51  ;;  %2208 = vrot.lane.b32.xlu0 %v2207_v53, %s2330_s22  ;;  %v2231_v51 = vld [vmem:[%s2890_s10 + $0x28] sm:$0xff]   ;;  %v1844_v53 = vld [vmem:[%s2893_s9 + $0x1] ss:$0 sm:$0xff] }
0x107d   :  { %2092 = vmatpush3.bf16.msra.mxu1 %v2231_v51 }
0x107e   :  { %2203 = vrot.lane.b32.xlu1 %v2202_v16, %s2320_s21  ;;  %2093 = vmatprep.subr.bf16.mxu1 %v2317_v4 }
0x1081   :  { %2094 = vmatpush3.bf16.msra.mxu1 %v2232_v52 }
0x10e6   :  { %v2199_v3 = vpop.permute.xlu0 %2198 }
0x10e7   :  { %v2201_v58 = vunpack.i.h.bf16 %v2199_v3  ;;  %v2200_v59 = vunpack.i.l.bf16 %v2199_v3 }
0x10e9   :  { %v1365_v0 = vsel %vm348_vm13, %v1310_v41, %v2200_v59  ;;  %v1366_v1 = vsel %vm348_vm13, %v1313_v48, %v2201_v58 }
0x10ee   :  { %v2209_v60 = vpop.permute.xlu0 %2208 }
0x10ef   :  { %v2211_v2 = vunpack.i.h.bf16 %v2209_v60  ;;  %v2210_v5 = vunpack.i.l.bf16 %v2209_v60 }
0x10f0   :  { %v2204_v61 = vpop.permute.xlu1 %2203 }
0x10f1   :  { %v2206_v62 = vunpack.i.h.bf16 %v2204_v61  ;;  %v2205_v63 = vunpack.i.l.bf16 %v2204_v61 }
0x10f3   :  { %v1368_v6 = vsel %vm136_vm8, %v1366_v1, %v2206_v62  ;;  %v1367_v7 = vsel %vm136_vm8, %v1365_v0, %v2205_v63  ;;  %v1857_v0 = vld [vmem:[%s2894_s11 + $0x1] ss:$0 sm:$0xff] }
0x10f4   :  { %v1370_v8 = vsel %vm647_vm14, %v1368_v6, %v2211_v2  ;;  %v1369_v9 = vsel %vm647_vm14, %v1367_v7, %v2210_v5 }
0x10f5   :  { %v1371_v57 = vpack.c.bf16 %v1370_v8, %v1369_v9 }
0x10f7   :  { %2076 = vmatmul.mubr.msk.bf16.vlgmr.msra.gmra.mxu0 %vm139_vm9, %v1371_v57 }
0x10f8   :  { %2083 = vmatprep.mubr.msk.bf16.mxu0 %vm2323_vm12, %v2317_v4 }
0x11b7   :  { %v1434_v13 = vpop.f32.mrf.mxu0 }
0x11b8   :  { %v1435_v56 = vadd.f32 %v1831_v10, %v1434_v13 }
0x11b9   :  { %v2077_v14 = vpop.f32.mrf.mxu0 }
0x11ba   :  { %v1441_v15 = vadd.f32 %v1435_v56, %v2700_v30 }
0x11bb   :  { %v1437_v12 = vpop.f32.mrf.mxu0 }
0x11bc   :  { %v1438_v17 = vadd.f32 %v1831_v10, %v1437_v12  ;;  %v1447_v26 = vsel %vm139_vm9, %v1441_v15, 0.0 }
0x11bd   :  { %1448 = vadd.xlane.f32.xlu1 %v1447_v26  ;;  %v2078_v18 = vpop.f32.mrf.mxu0 }
0x11be   :  { %v1442_v11 = vadd.f32 %v1438_v17, %v2702_v32  ;;  %v2227_v32 = vld [vmem:[%s2889_s8 + $0x18] sm:$0xff]  }
0x11bf   :  { %2080 = vmatpush3.bf16.msra.mxu0 %v2227_v32 }
0x11c0   :  { %v1450_v45 = vsel %vm139_vm9, %v1442_v11, 0.0  ;;  %2081 = vmatprep.subr.bf16.mxu0 %v2317_v4 }
0x11c1   :  { %1451 = vadd.xlane.f32.xlu0 %v1450_v45 }
0x11c3   :  { %2082 = vmatpush3.bf16.msra.mxu0 %v2228_v38  ;;  %v1865_v38 = vld [vmem:[%s2895_s14 + $0x1] ss:$0 sm:$0xff] }
0x11c4   :  { %2099 = vmatprep.subr.bf16.mxu0 %v2317_v4 }
0x1246   :  { %v1449_v27 = vpop.xlane.xlu1 %1448 }
0x1247   :  { %v1453_v54 = vmul.f32 0.03125, %v1449_v27 }
0x1249   :  { %v1455_v19 = vsub.f32 %v1441_v15, %v1453_v54  ;;  %v2233_v54 = vld [vmem:[%s2897_s16 + $0x8] sm:$0xff]  }
0x124a   :  { %v1452_v20 = vpop.xlane.xlu0 %1451 }
0x124b   :  { %v1454_v31 = vmul.f32 0.03125, %v1452_v20  ;;  %v1457_v34 = vmul.f32 %v1455_v19, %v1455_v19 }
0x124d   :  { %v1456_v21 = vsub.f32 %v1442_v11, %v1454_v31  ;;  %v1459_v30 = vsel %vm139_vm9, %v1457_v34, 0.0 }
0x124e   :  { %1460 = vadd.xlane.f32.xlu0 %v1459_v30 }
0x124f   :  { %v1458_v22 = vmul.f32 %v1456_v21, %v1456_v21 }
0x1251   :  { %v1462_v23 = vsel %vm139_vm9, %v1458_v22, 0.0 }
0x1252   :  { %1463 = vadd.xlane.f32.xlu1 %v1462_v23 }
0x12d7   :  { %v1461_v25 = vpop.xlane.xlu0 %1460 }
0x12d8   :  { %v1465_v28 = vmul.f32 0.03125, %v1461_v25 }
0x12da   :  { %v1467_v29 = vadd.f32 1e-05, %v1465_v28 }
0x12db   :  { %v1464_v33 = vpop.xlane.xlu1 %1463 }
0x12dc   :  { %2307 = vrsqrt.f32 %v1467_v29  ;;  %v1466_v46 = vmul.f32 0.03125, %v1464_v33 }
0x12de   :  { %v1468_v35 = vadd.f32 1e-05, %v1466_v46 }
0x12e0   :  { %2309 = vrsqrt.f32 %v1468_v35  ;;  %v1867_v35 = vld [vmem:[%s2898_s17] ss:$0 sm:$0xff] }
0x12e9   :  { %v2308_v50 = vpop.eup %2307 }
0x12ea   :  { %v1471_v36 = vmul.f32 %v2308_v50, %v1455_v19  ;;  %v2234_v19 = vld [vmem:[%s2897_s16] sm:$0xff]  }
0x12ec   :  { %v1479_v41 = vmul.f32 %v1837_v37, %v1471_v36 }
0x12ed   :  { %v2310_v39 = vpop.eup %2309 }
0x12ee   :  { %v1472_v40 = vmul.f32 %v2310_v39, %v1456_v21  ;;  %v1487_v47 = vadd.f32 %v1838_v43, %v1479_v41 }
0x12f0   :  { %v1480_v44 = vmul.f32 %v1837_v37, %v1472_v40 }
0x12f2   :  { %v1488_v48 = vadd.f32 %v1838_v43, %v1480_v44 }
0x12f4   :  { %v1489_v49 = vpack.c.bf16 %v1488_v48, %v1487_v47 }
0x12f6   :  { %2084 = vmatmul.mubr.msk.bf16.vlgmr.msra.gmra.mxu0 %vm139_vm9, %v1489_v49 }
0x12f7   :  { %2103 = vmatprep.mubr.msk.bf16.mxu0 %vm2323_vm12, %v2317_v4  ;;  %2100 = vmatpush3.bf16.msra.mxu0 %v2233_v54 }
0x12f8   :  { %2101 = vmatprep.subr.bf16.mxu0 %v2317_v4  ;;  %v1866_v4 = vld [vmem:[%s2896_s15 + $0x1] ss:$0 sm:$0xff] }
0x12fb   :  { %2102 = vmatpush3.bf16.msra.mxu0 %v2234_v19 }
0x13b6   :  { %v1552_v55 = vpop.f32.mrf.mxu0 }
0x13b7   :  { %v1553_v3 = vadd.f32 %v1844_v53, %v1552_v55 }
0x13b8   :  { %v2085_v16 = vpop.f32.mrf.mxu0 }
0x13b9   :  { %v1559_v61 = vmax.f32 %v1553_v3, 0.0 }
0x13ba   :  { %v1555_v58 = vpop.f32.mrf.mxu0 }
0x13bb   :  { %v1556_v59 = vadd.f32 %v1844_v53, %v1555_v58 }
0x13bc   :  { %v2086_v60 = vpop.f32.mrf.mxu0 }
0x13bd   :  { %v1560_v62 = vmax.f32 %v1556_v59, 0.0 }
0x13bf   :  { %v1561_v63 = vpack.c.bf16 %v1560_v62, %v1559_v61 }
0x13c1   :  { %2096 = vmatmul.mubr.msk.bf16.vlgmr.msra.gmra.mxu1 %vm154_vm11, %v1561_v63 }
0x1481   :  { %v1640_v1 = vpop.f32.mrf.mxu1 }
0x1482   :  { %v1641_v2 = vadd.f32 %v1857_v0, %v1640_v1 }
0x1483   :  { %v2097_v5 = vpop.f32.mrf.mxu1 }
0x1484   :  { %v1647_v6 = vadd.f32 %v1641_v2, %v1487_v47 }
0x1485   :  { %v1643_v7 = vpop.f32.mrf.mxu1 }
0x1486   :  { %v1644_v8 = vadd.f32 %v1857_v0, %v1643_v7  ;;  %v1653_v9 = vsel %vm139_vm9, %v1647_v6, 0.0 }
0x1487   :  { %1654 = vadd.xlane.f32.xlu0 %v1653_v9  ;;  %v2098_v57 = vpop.f32.mrf.mxu1 }
0x1488   :  { %v1648_v10 = vadd.f32 %v1644_v8, %v1488_v48 }
0x148a   :  { %v1656_v13 = vsel %vm139_vm9, %v1648_v10, 0.0 }
0x148b   :  { %1657 = vadd.xlane.f32.xlu1 %v1656_v13 }
0x1510   :  { %v1655_v56 = vpop.xlane.xlu0 %1654 }
0x1511   :  { %v1659_v14 = vmul.f32 0.03125, %v1655_v56 }
0x1513   :  { %v1661_v15 = vsub.f32 %v1647_v6, %v1659_v14 }
0x1514   :  { %v1658_v12 = vpop.xlane.xlu1 %1657 }
0x1515   :  { %v1660_v17 = vmul.f32 0.03125, %v1658_v12  ;;  %v1663_v26 = vmul.f32 %v1661_v15, %v1661_v15 }
0x1517   :  { %v1662_v18 = vsub.f32 %v1648_v10, %v1660_v17  ;;  %v1665_v11 = vsel %vm139_vm9, %v1663_v26, 0.0 }
0x1518   :  { %1666 = vadd.xlane.f32.xlu0 %v1665_v11 }
0x1519   :  { %v1664_v45 = vmul.f32 %v1662_v18, %v1662_v18 }
0x151b   :  { %v1668_v27 = vsel %vm139_vm9, %v1664_v45, 0.0 }
0x151c   :  { %1669 = vadd.xlane.f32.xlu1 %v1668_v27 }
0x15a1   :  { %v1667_v20 = vpop.xlane.xlu0 %1666 }
0x15a2   :  { %v1671_v31 = vmul.f32 0.03125, %v1667_v20 }
0x15a4   :  { %v1673_v34 = vadd.f32 1e-05, %v1671_v31 }
0x15a5   :  { %v1670_v21 = vpop.xlane.xlu1 %1669 }
0x15a6   :  { %2311 = vrsqrt.f32 %v1673_v34  ;;  %v1672_v30 = vmul.f32 0.03125, %v1670_v21 }
0x15a8   :  { %v1674_v22 = vadd.f32 1e-05, %v1672_v30 }
0x15aa   :  { %2313 = vrsqrt.f32 %v1674_v22 }
0x15b3   :  { %v2312_v23 = vpop.eup %2311 }
0x15b4   :  { %v1677_v32 = vmul.f32 %v2312_v23, %v1661_v15 }
0x15b6   :  { %v1685_v25 = vmul.f32 %v1865_v38, %v1677_v32 }
0x15b7   :  { %v2314_v42 = vpop.eup %2313 }
0x15b8   :  { %v1678_v24 = vmul.f32 %v2314_v42, %v1662_v18  ;;  %v1693_v29 = vadd.f32 %v1866_v4, %v1685_v25 }
0x15ba   :  { %v1686_v28 = vmul.f32 %v1865_v38, %v1678_v24 }
0x15bc   :  { %v1694_v33 = vadd.f32 %v1866_v4, %v1686_v28 }
0x15be   :  { %v1695_v46 = vpack.c.bf16 %v1694_v33, %v1693_v29 }
0x15c0   :  { %2104 = vmatmul.mubr.msk.bf16.vlgmr.msra.gmra.mxu0 %vm139_vm9, %v1695_v46 }
0x1680   :  { %v1756_v50 = vpop.f32.mrf.mxu0 }
0x1681   :  { %v1757_v36 = vadd.f32 %v1867_v35, %v1756_v50 }
0x1682   :  { %v2105_v37 = vpop.f32.mrf.mxu0 }
0x1683   :  { %1763 = vst [vmem:[%s2899_s18] sm:$0xff] %v1757_v36 }
0x1684   :  { %v1759_v39 = vpop.f32.mrf.mxu0 }
0x1685   :  { %v1760_v40 = vadd.f32 %v1867_v35, %v1759_v39 }
0x1686   :  { %v2106_v41 = vpop.f32.mrf.mxu0 }
0x1687   :  { %1764 = vst [vmem:[%s2899_s18 + $0x8] sm:$0xff] %v1760_v40 }

</bundles_post_ra>
